<compile_context>
chip_gen: v7x
topology: tpu7x:2x2x1
jax: 0.10.0
libtpu: 0.0.40
codegen_flags: <defaults>
</compile_context>

<pallas_src>
import functools

import jax
import jax.numpy as jnp
from jax import lax
from jax.experimental import pallas as pl
from jax.experimental.pallas import tpu as pltpu


def _make_dwconv_kernel(*, m, KH, KW, ph, pw, Cb, Cib, H, W, Ho, Wo,
                        use_scratch):
    """Build the kernel body for one (batch, output-channel-block) grid step."""

    def kernel(x_ref, w_ref, b_ref, o_ref, *scratch):
        # x_ref: (Cib, H, W)      input channels for this block (input dtype, VMEM)
        # w_ref: (C_out*KH*KW,)   flattened normalized taps       (f32, SMEM)
        # b_ref: (C_out,)         bias                            (f32, SMEM)
        # o_ref: (Cb, Ho, Wo)     output channels for this block
        # scratch[0] (optional): (Cib, Hp, Wp) f32 zero-padded input slabs
        c_base = pl.program_id(1) * Cb

        if use_scratch:
            xpad_ref = scratch[0]
            Hp = H + 2 * ph
            Wp = W + 2 * pw
            for ci in range(Cib):
                # Zero only the border strips; the interior is fully
                # overwritten by the copy below (no full-tile fill pass).
                if ph > 0:
                    xpad_ref[ci, 0:ph, :] = jnp.zeros((ph, Wp), jnp.float32)
                    xpad_ref[ci, ph + H:Hp, :] = jnp.zeros((ph, Wp), jnp.float32)
                if pw > 0:
                    xpad_ref[ci, :, 0:pw] = jnp.zeros((Hp, pw), jnp.float32)
                    xpad_ref[ci, :, pw + W:Wp] = jnp.zeros((Hp, pw), jnp.float32)
                # Single hoisted upcast of the input slab into the scratch.
                xpad_ref[ci, ph:ph + H, pw:pw + W] = x_ref[ci].astype(jnp.float32)

            def tap(ci, kh, kw):
                return xpad_ref[ci, kh:kh + Ho, kw:kw + Wo]
        else:
            # padding == 0 and input already f32: read taps straight from the
            # input block (saves a full-tile store + load per step).
            def tap(ci, kh, kw):
                return x_ref[ci, kh:kh + Ho, kw:kw + Wo]

        # Static per-output-channel tap loop: shifted *loads* (no materialized
        # shifted copies); each tap and the bias are scalar SMEM operands on
        # the scalar/sld path, multiplied into full (Ho, Wo) slabs on the VPU.
        for j in range(Cb):
            ci = j // m                       # grouped-conv channel multiplier
            co = c_base + j                   # global output channel (traced)
            wbase = co * (KH * KW)
            # Bias folded into the accumulator init.
            acc = tap(ci, 0, 0) * w_ref[wbase] + b_ref[co]
            for kh in range(KH):
                for kw in range(KW):
                    if kh == 0 and kw == 0:
                        continue
                    acc = acc + tap(ci, kh, kw) * w_ref[wbase + kh * KW + kw]
            o_ref[j] = acc.astype(o_ref.dtype)   # single cast + single store

    return kernel


def _vmem_limit_bytes():
    # Use ~3/4 of physical VMEM (headroom for Mosaic scratch / double buffers);
    # conservative 32 MiB fallback if the query is unavailable.
    try:
        cap = getattr(pltpu.get_tpu_info(), "vmem_capacity_bytes", None)
        if cap:
            return max(32 * 1024 * 1024, min(int(cap) * 3 // 4, 96 * 1024 * 1024))
    except Exception:
        pass
    return 32 * 1024 * 1024


def _pick_channel_block(C_out, m, per_out_channel_bytes, budget_bytes, cap=16):
    """Largest Cb that is a multiple of m, divides C_out, fits budget, <= cap."""
    best = m
    c = m
    while c <= C_out and c <= cap:
        if C_out % c == 0 and c * per_out_channel_bytes <= budget_bytes:
            best = c
        c += m
    return best


@functools.partial(
    jax.jit, static_argnames=("kernel_size", "stride", "padding", "dilation"))
def partial_conv(x_nchw, v, g, bias, *, kernel_size, stride=1, padding=0,
                 dilation=1):
    """Forward of PartialConv (weight-normalized depthwise Conv2d).

    x_nchw: (N, C_in, H, W)
    v:      (C_out, 1, KH, KW)   weight_norm direction parameter
    g:      (C_out,)             weight_norm magnitude parameter
    bias:   (C_out,)
    """
    assert stride == 1 and dilation == 1, \
        "PartialConv is used with stride=1, dilation=1 (not implemented otherwise)"
    N, C_in, H, W = x_nchw.shape
    C_out = v.shape[0]
    assert C_out % C_in == 0, "depthwise conv needs out_channels % in_channels == 0"
    m = C_out // C_in
    KH = KW = int(kernel_size)
    p = int(padding)
    Ho = H + 2 * p - KH + 1
    Wo = W + 2 * p - KW + 1
    assert Ho > 0 and Wo > 0

    # --- weight norm (tiny parameter glue, plain JAX; matches PyTorch, no eps) ---
    v_f32 = v.astype(jnp.float32)
    v_norm = jnp.sqrt(jnp.sum(v_f32 * v_f32, axis=(1, 2, 3), keepdims=True))
    w_okk = g.astype(jnp.float32).reshape(-1, 1, 1, 1) * v_f32 / v_norm
    # Flatten to 1-D for SMEM (avoids the 2-D SMEM [8,128]-word padding blowup).
    w_flat = w_okk.reshape(C_out * KH * KW)
    b_flat = bias.astype(jnp.float32).reshape(C_out)

    itemsize = jnp.dtype(x_nchw.dtype).itemsize
    use_scratch = (p > 0) or (x_nchw.dtype != jnp.float32)
    Hp, Wp = H + 2 * p, W + 2 * p

    # Approximate per-output-channel per-step VMEM (2x for double-buffered
    # pipelined blocks) to bound the channel block.
    per_oc_bytes = (2 * H * W * itemsize
                    + (Hp * Wp * 4 if use_scratch else 0)) // m \
                   + 2 * Ho * Wo * itemsize
    Cb = _pick_channel_block(C_out, m, per_oc_bytes, budget_bytes=8 << 20, cap=16)
    Cib = Cb // m

    kernel = _make_dwconv_kernel(m=m, KH=KH, KW=KW, ph=p, pw=p, Cb=Cb, Cib=Cib,
                                 H=H, W=W, Ho=Ho, Wo=Wo, use_scratch=use_scratch)
    scratch_shapes = ([pltpu.VMEM((Cib, Hp, Wp), jnp.float32)]
                      if use_scratch else [])

    fn = pl.pallas_call(
        kernel,
        out_shape=jax.ShapeDtypeStruct((N, C_out, Ho, Wo), x_nchw.dtype),
        grid_spec=pltpu.PrefetchScalarGridSpec(
            num_scalar_prefetch=0,
            grid=(N, C_out // Cb),
            in_specs=[
                # Output-channel block c consumes input-channel block c
                # (PyTorch group-major grouped-conv layout; Cib = Cb // m).
                pl.BlockSpec((None, Cib, H, W), lambda n, c: (n, c, 0, 0)),
                # Taps + bias: whole arrays resident in SMEM (one copy total,
                # no per-step DMAs); read as scalar operands in the kernel.
                pl.BlockSpec(memory_space=pltpu.MemorySpace.SMEM),
                pl.BlockSpec(memory_space=pltpu.MemorySpace.SMEM),
            ],
            out_specs=pl.BlockSpec((None, Cb, Ho, Wo),
                                   lambda n, c: (n, c, 0, 0)),
            scratch_shapes=scratch_shapes,
        ),
        compiler_params=pltpu.CompilerParams(
            dimension_semantics=("parallel", "parallel"),
            vmem_limit_bytes=_vmem_limit_bytes(),
        ),
        cost_estimate=pl.CostEstimate(
            flops=2 * KH * KW * N * C_out * Ho * Wo,
            transcendentals=0,
            bytes_accessed=(N * C_in * H * W + N * C_out * Ho * Wo) * itemsize
                           + C_out * (KH * KW + 1) * 4,
        ),
    )
    return fn(x_nchw, w_flat, b_flat)


def _reference(x_nchw, v, g, bias, *, kernel_size, padding):
    """Pure-JAX reference (lax depthwise conv) for correctness check."""
    C_in = x_nchw.shape[1]
    v_f32 = v.astype(jnp.float32)
    v_norm = jnp.sqrt(jnp.sum(v_f32 * v_f32, axis=(1, 2, 3), keepdims=True))
    w = g.astype(jnp.float32).reshape(-1, 1, 1, 1) * v_f32 / v_norm
    out = lax.conv_general_dilated(
        x_nchw.astype(jnp.float32), w,
        window_strides=(1, 1), padding=[(padding, padding)] * 2,
        dimension_numbers=("NCHW", "OIHW", "NCHW"),
        feature_group_count=C_in,
    )
    return out + bias.reshape(1, -1, 1, 1).astype(jnp.float32)


if __name__ == "__main__":
    key = jax.random.PRNGKey(0)

    configs = [
        # (N, C_in, C_out, H, W, K, P)
        (2, 4, 4, 16, 16, 3, 1),   # in == out channels, 'same' padding (scratch path)
        (2, 4, 8, 16, 16, 3, 0),   # channel multiplier m=2, no padding (direct path)
        (2, 4, 8, 16, 16, 3, 1),   # m=2 with padding (multi-channel scratch path)
    ]
    for (N, C_in, C_out, H, W, K, P) in configs:
        key, k_x, k_v, k_g, k_b = jax.random.split(key, 5)
        x = jax.random.normal(k_x, (N, C_in, H, W), dtype=jnp.float32)
        v = jax.random.normal(k_v, (C_out, 1, K, K), dtype=jnp.float32)
        g = jnp.sqrt(jnp.sum(v * v, axis=(1, 2, 3))) * jax.random.uniform(
            k_g, (C_out,), minval=0.5, maxval=1.5)
        b = jax.random.normal(k_b, (C_out,), dtype=jnp.float32) * 0.1

        out = jax.block_until_ready(
            partial_conv(x, v, g, b, kernel_size=K, padding=P))

        ref = _reference(x, v, g, b, kernel_size=K, padding=P)
        Ho = H + 2 * P - K + 1
        Wo = W + 2 * P - K + 1
        assert out.shape == (N, C_out, Ho, Wo)
        err = float(jnp.max(jnp.abs(out - ref.astype(out.dtype))))
        assert err < 1e-4, \
            f"max abs err {err} for config {(N, C_in, C_out, H, W, K, P)}"

    print("KERNEL_OK")
</pallas_src>

<mosaic_0001>
module attributes {stable_mosaic.version = 11 : i64} {
  func.func @kernel(%arg0: i32, %arg1: i32, %arg2: memref<1x4x16x16xf32, #tpu.memory_space<vmem>>, %arg3: memref<36xf32, #tpu.memory_space<smem>>, %arg4: memref<4xf32, #tpu.memory_space<smem>>, %arg5: memref<1x4x16x16xf32, #tpu.memory_space<vmem>>, %arg6: memref<4x18x18xf32, #tpu.memory_space<vmem>>) attributes {dimension_semantics = [#tpu.dimension_semantics<parallel>, #tpu.dimension_semantics<parallel>], iteration_bounds = array<i64: 2, 1>, scalar_prefetch = 0 : i64, scratch_operands = 1 : i64, tpu.core_type = #tpu.core_type<tc>, window_params = [{transform_indices = @transform_0, window_bounds = array<i64: 1, 4, 16, 16>}, {transform_indices = @transform_1, window_bounds = array<i64: 36>}, {transform_indices = @transform_2, window_bounds = array<i64: 4>}, {transform_indices = @transform_3, window_bounds = array<i64: 1, 4, 16, 16>}]} {
    %c4_i32 = arith.constant 4 : i32
    %0 = arith.muli %arg1, %c4_i32 : i32
    %cst = arith.constant 0.000000e+00 : f32
    %1 = vector.broadcast %cst : f32 to vector<1x18xf32>
    %c0 = arith.constant 0 : index
    %c0_0 = arith.constant 0 : index
    %c0_1 = arith.constant 0 : index
    %2 = vector.load %arg6[%c0, %c0_0, %c0_1] : memref<4x18x18xf32, #tpu.memory_space<vmem>>, vector<1x1x18xf32>
    %3 = vector.shape_cast %2 : vector<1x1x18xf32> to vector<1x18xf32>
    %4 = vector.shape_cast %1 : vector<1x18xf32> to vector<1x1x18xf32>
    tpu.vector_store %arg6[%c0, %c0_0, %c0_1], %4 {strides = array<i32>} : memref<4x18x18xf32, #tpu.memory_space<vmem>>, vector<1x1x18xf32>,
    %cst_2 = arith.constant 0.000000e+00 : f32
    %5 = vector.broadcast %cst_2 : f32 to vector<1x18xf32>
    %c0_3 = arith.constant 0 : index
    %c17 = arith.constant 17 : index
    %c0_4 = arith.constant 0 : index
    %6 = vector.load %arg6[%c0_3, %c17, %c0_4] : memref<4x18x18xf32, #tpu.memory_space<vmem>>, vector<1x1x18xf32>
    %7 = vector.shape_cast %6 : vector<1x1x18xf32> to vector<1x18xf32>
    %8 = vector.shape_cast %5 : vector<1x18xf32> to vector<1x1x18xf32>
    tpu.vector_store %arg6[%c0_3, %c17, %c0_4], %8 {strides = array<i32>} : memref<4x18x18xf32, #tpu.memory_space<vmem>>, vector<1x1x18xf32>,
    %cst_5 = arith.constant 0.000000e+00 : f32
    %9 = vector.broadcast %cst_5 : f32 to vector<18x1xf32>
    %c0_6 = arith.constant 0 : index
    %c0_7 = arith.constant 0 : index
    %c0_8 = arith.constant 0 : index
    %10 = vector.load %arg6[%c0_6, %c0_7, %c0_8] : memref<4x18x18xf32, #tpu.memory_space<vmem>>, vector<1x18x1xf32>
    %11 = vector.shape_cast %10 : vector<1x18x1xf32> to vector<18x1xf32>
    %12 = vector.shape_cast %9 : vector<18x1xf32> to vector<1x18x1xf32>
    tpu.vector_store %arg6[%c0_6, %c0_7, %c0_8], %12 {strides = array<i32>} : memref<4x18x18xf32, #tpu.memory_space<vmem>>, vector<1x18x1xf32>,
    %cst_9 = arith.constant 0.000000e+00 : f32
    %13 = vector.broadcast %cst_9 : f32 to vector<18x1xf32>
    %c0_10 = arith.constant 0 : index
    %c0_11 = arith.constant 0 : index
    %c17_12 = arith.constant 17 : index
    %14 = vector.load %arg6[%c0_10, %c0_11, %c17_12] : memref<4x18x18xf32, #tpu.memory_space<vmem>>, vector<1x18x1xf32>
    %15 = vector.shape_cast %14 : vector<1x18x1xf32> to vector<18x1xf32>
    %16 = vector.shape_cast %13 : vector<18x1xf32> to vector<1x18x1xf32>
    tpu.vector_store %arg6[%c0_10, %c0_11, %c17_12], %16 {strides = array<i32>} : memref<4x18x18xf32, #tpu.memory_space<vmem>>, vector<1x18x1xf32>,
    %c0_13 = arith.constant 0 : index
    %c0_14 = arith.constant 0 : index
    %c0_15 = arith.constant 0 : index
    %c0_16 = arith.constant 0 : index
    %17 = vector.load %arg2[%c0_13, %c0_14, %c0_15, %c0_16] : memref<1x4x16x16xf32, #tpu.memory_space<vmem>>, vector<1x1x16x16xf32>
    %18 = vector.shape_cast %17 : vector<1x1x16x16xf32> to vector<16x16xf32>
    %c0_17 = arith.constant 0 : index
    %c1 = arith.constant 1 : index
    %c1_18 = arith.constant 1 : index
    %19 = vector.load %arg6[%c0_17, %c1, %c1_18] : memref<4x18x18xf32, #tpu.memory_space<vmem>>, vector<1x16x16xf32>
    %20 = vector.shape_cast %19 : vector<1x16x16xf32> to vector<16x16xf32>
    %21 = vector.shape_cast %18 : vector<16x16xf32> to vector<1x16x16xf32>
    tpu.vector_store %arg6[%c0_17, %c1, %c1_18], %21 {strides = array<i32>} : memref<4x18x18xf32, #tpu.memory_space<vmem>>, vector<1x16x16xf32>,
    %cst_19 = arith.constant 0.000000e+00 : f32
    %22 = vector.broadcast %cst_19 : f32 to vector<1x18xf32>
    %c1_20 = arith.constant 1 : index
    %c0_21 = arith.constant 0 : index
    %c0_22 = arith.constant 0 : index
    %23 = vector.load %arg6[%c1_20, %c0_21, %c0_22] : memref<4x18x18xf32, #tpu.memory_space<vmem>>, vector<1x1x18xf32>
    %24 = vector.shape_cast %23 : vector<1x1x18xf32> to vector<1x18xf32>
    %25 = vector.shape_cast %22 : vector<1x18xf32> to vector<1x1x18xf32>
    tpu.vector_store %arg6[%c1_20, %c0_21, %c0_22], %25 {strides = array<i32>} : memref<4x18x18xf32, #tpu.memory_space<vmem>>, vector<1x1x18xf32>,
    %cst_23 = arith.constant 0.000000e+00 : f32
    %26 = vector.broadcast %cst_23 : f32 to vector<1x18xf32>
    %c1_24 = arith.constant 1 : index
    %c17_25 = arith.constant 17 : index
    %c0_26 = arith.constant 0 : index
    %27 = vector.load %arg6[%c1_24, %c17_25, %c0_26] : memref<4x18x18xf32, #tpu.memory_space<vmem>>, vector<1x1x18xf32>
    %28 = vector.shape_cast %27 : vector<1x1x18xf32> to vector<1x18xf32>
    %29 = vector.shape_cast %26 : vector<1x18xf32> to vector<1x1x18xf32>
    tpu.vector_store %arg6[%c1_24, %c17_25, %c0_26], %29 {strides = array<i32>} : memref<4x18x18xf32, #tpu.memory_space<vmem>>, vector<1x1x18xf32>,
    %cst_27 = arith.constant 0.000000e+00 : f32
    %30 = vector.broadcast %cst_27 : f32 to vector<18x1xf32>
    %c1_28 = arith.constant 1 : index
    %c0_29 = arith.constant 0 : index
    %c0_30 = arith.constant 0 : index
    %31 = vector.load %arg6[%c1_28, %c0_29, %c0_30] : memref<4x18x18xf32, #tpu.memory_space<vmem>>, vector<1x18x1xf32>
    %32 = vector.shape_cast %31 : vector<1x18x1xf32> to vector<18x1xf32>
    %33 = vector.shape_cast %30 : vector<18x1xf32> to vector<1x18x1xf32>
    tpu.vector_store %arg6[%c1_28, %c0_29, %c0_30], %33 {strides = array<i32>} : memref<4x18x18xf32, #tpu.memory_space<vmem>>, vector<1x18x1xf32>,
    %cst_31 = arith.constant 0.000000e+00 : f32
    %34 = vector.broadcast %cst_31 : f32 to vector<18x1xf32>
    %c1_32 = arith.constant 1 : index
    %c0_33 = arith.constant 0 : index
    %c17_34 = arith.constant 17 : index
    %35 = vector.load %arg6[%c1_32, %c0_33, %c17_34] : memref<4x18x18xf32, #tpu.memory_space<vmem>>, vector<1x18x1xf32>
    %36 = vector.shape_cast %35 : vector<1x18x1xf32> to vector<18x1xf32>
    %37 = vector.shape_cast %34 : vector<18x1xf32> to vector<1x18x1xf32>
    tpu.vector_store %arg6[%c1_32, %c0_33, %c17_34], %37 {strides = array<i32>} : memref<4x18x18xf32, #tpu.memory_space<vmem>>, vector<1x18x1xf32>,
    %c0_35 = arith.constant 0 : index
    %c1_36 = arith.constant 1 : index
    %c0_37 = arith.constant 0 : index
    %c0_38 = arith.constant 0 : index
    %38 = vector.load %arg2[%c0_35, %c1_36, %c0_37, %c0_38] : memref<1x4x16x16xf32, #tpu.memory_space<vmem>>, vector<1x1x16x16xf32>
    %39 = vector.shape_cast %38 : vector<1x1x16x16xf32> to vector<16x16xf32>
    %c1_39 = arith.constant 1 : index
    %c1_40 = arith.constant 1 : index
    %c1_41 = arith.constant 1 : index
    %40 = vector.load %arg6[%c1_39, %c1_40, %c1_41] : memref<4x18x18xf32, #tpu.memory_space<vmem>>, vector<1x16x16xf32>
    %41 = vector.shape_cast %40 : vector<1x16x16xf32> to vector<16x16xf32>
    %42 = vector.shape_cast %39 : vector<16x16xf32> to vector<1x16x16xf32>
    tpu.vector_store %arg6[%c1_39, %c1_40, %c1_41], %42 {strides = array<i32>} : memref<4x18x18xf32, #tpu.memory_space<vmem>>, vector<1x16x16xf32>,
    %cst_42 = arith.constant 0.000000e+00 : f32
    %43 = vector.broadcast %cst_42 : f32 to vector<1x18xf32>
    %c2 = arith.constant 2 : index
    %c0_43 = arith.constant 0 : index
    %c0_44 = arith.constant 0 : index
    %44 = vector.load %arg6[%c2, %c0_43, %c0_44] : memref<4x18x18xf32, #tpu.memory_space<vmem>>, vector<1x1x18xf32>
    %45 = vector.shape_cast %44 : vector<1x1x18xf32> to vector<1x18xf32>
    %46 = vector.shape_cast %43 : vector<1x18xf32> to vector<1x1x18xf32>
    tpu.vector_store %arg6[%c2, %c0_43, %c0_44], %46 {strides = array<i32>} : memref<4x18x18xf32, #tpu.memory_space<vmem>>, vector<1x1x18xf32>,
    %cst_45 = arith.constant 0.000000e+00 : f32
    %47 = vector.broadcast %cst_45 : f32 to vector<1x18xf32>
    %c2_46 = arith.constant 2 : index
    %c17_47 = arith.constant 17 : index
    %c0_48 = arith.constant 0 : index
    %48 = vector.load %arg6[%c2_46, %c17_47, %c0_48] : memref<4x18x18xf32, #tpu.memory_space<vmem>>, vector<1x1x18xf32>
    %49 = vector.shape_cast %48 : vector<1x1x18xf32> to vector<1x18xf32>
    %50 = vector.shape_cast %47 : vector<1x18xf32> to vector<1x1x18xf32>
    tpu.vector_store %arg6[%c2_46, %c17_47, %c0_48], %50 {strides = array<i32>} : memref<4x18x18xf32, #tpu.memory_space<vmem>>, vector<1x1x18xf32>,
    %cst_49 = arith.constant 0.000000e+00 : f32
    %51 = vector.broadcast %cst_49 : f32 to vector<18x1xf32>
    %c2_50 = arith.constant 2 : index
    %c0_51 = arith.constant 0 : index
    %c0_52 = arith.constant 0 : index
    %52 = vector.load %arg6[%c2_50, %c0_51, %c0_52] : memref<4x18x18xf32, #tpu.memory_space<vmem>>, vector<1x18x1xf32>
    %53 = vector.shape_cast %52 : vector<1x18x1xf32> to vector<18x1xf32>
    %54 = vector.shape_cast %51 : vector<18x1xf32> to vector<1x18x1xf32>
    tpu.vector_store %arg6[%c2_50, %c0_51, %c0_52], %54 {strides = array<i32>} : memref<4x18x18xf32, #tpu.memory_space<vmem>>, vector<1x18x1xf32>,
    %cst_53 = arith.constant 0.000000e+00 : f32
    %55 = vector.broadcast %cst_53 : f32 to vector<18x1xf32>
    %c2_54 = arith.constant 2 : index
    %c0_55 = arith.constant 0 : index
    %c17_56 = arith.constant 17 : index
    %56 = vector.load %arg6[%c2_54, %c0_55, %c17_56] : memref<4x18x18xf32, #tpu.memory_space<vmem>>, vector<1x18x1xf32>
    %57 = vector.shape_cast %56 : vector<1x18x1xf32> to vector<18x1xf32>
    %58 = vector.shape_cast %55 : vector<18x1xf32> to vector<1x18x1xf32>
    tpu.vector_store %arg6[%c2_54, %c0_55, %c17_56], %58 {strides = array<i32>} : memref<4x18x18xf32, #tpu.memory_space<vmem>>, vector<1x18x1xf32>,
    %c0_57 = arith.constant 0 : index
    %c2_58 = arith.constant 2 : index
    %c0_59 = arith.constant 0 : index
    %c0_60 = arith.constant 0 : index
    %59 = vector.load %arg2[%c0_57, %c2_58, %c0_59, %c0_60] : memref<1x4x16x16xf32, #tpu.memory_space<vmem>>, vector<1x1x16x16xf32>
    %60 = vector.shape_cast %59 : vector<1x1x16x16xf32> to vector<16x16xf32>
    %c2_61 = arith.constant 2 : index
    %c1_62 = arith.constant 1 : index
    %c1_63 = arith.constant 1 : index
    %61 = vector.load %arg6[%c2_61, %c1_62, %c1_63] : memref<4x18x18xf32, #tpu.memory_space<vmem>>, vector<1x16x16xf32>
    %62 = vector.shape_cast %61 : vector<1x16x16xf32> to vector<16x16xf32>
    %63 = vector.shape_cast %60 : vector<16x16xf32> to vector<1x16x16xf32>
    tpu.vector_store %arg6[%c2_61, %c1_62, %c1_63], %63 {strides = array<i32>} : memref<4x18x18xf32, #tpu.memory_space<vmem>>, vector<1x16x16xf32>,
    %cst_64 = arith.constant 0.000000e+00 : f32
    %64 = vector.broadcast %cst_64 : f32 to vector<1x18xf32>
    %c3 = arith.constant 3 : index
    %c0_65 = arith.constant 0 : index
    %c0_66 = arith.constant 0 : index
    %65 = vector.load %arg6[%c3, %c0_65, %c0_66] : memref<4x18x18xf32, #tpu.memory_space<vmem>>, vector<1x1x18xf32>
    %66 = vector.shape_cast %65 : vector<1x1x18xf32> to vector<1x18xf32>
    %67 = vector.shape_cast %64 : vector<1x18xf32> to vector<1x1x18xf32>
    tpu.vector_store %arg6[%c3, %c0_65, %c0_66], %67 {strides = array<i32>} : memref<4x18x18xf32, #tpu.memory_space<vmem>>, vector<1x1x18xf32>,
    %cst_67 = arith.constant 0.000000e+00 : f32
    %68 = vector.broadcast %cst_67 : f32 to vector<1x18xf32>
    %c3_68 = arith.constant 3 : index
    %c17_69 = arith.constant 17 : index
    %c0_70 = arith.constant 0 : index
    %69 = vector.load %arg6[%c3_68, %c17_69, %c0_70] : memref<4x18x18xf32, #tpu.memory_space<vmem>>, vector<1x1x18xf32>
    %70 = vector.shape_cast %69 : vector<1x1x18xf32> to vector<1x18xf32>
    %71 = vector.shape_cast %68 : vector<1x18xf32> to vector<1x1x18xf32>
    tpu.vector_store %arg6[%c3_68, %c17_69, %c0_70], %71 {strides = array<i32>} : memref<4x18x18xf32, #tpu.memory_space<vmem>>, vector<1x1x18xf32>,
    %cst_71 = arith.constant 0.000000e+00 : f32
    %72 = vector.broadcast %cst_71 : f32 to vector<18x1xf32>
    %c3_72 = arith.constant 3 : index
    %c0_73 = arith.constant 0 : index
    %c0_74 = arith.constant 0 : index
    %73 = vector.load %arg6[%c3_72, %c0_73, %c0_74] : memref<4x18x18xf32, #tpu.memory_space<vmem>>, vector<1x18x1xf32>
    %74 = vector.shape_cast %73 : vector<1x18x1xf32> to vector<18x1xf32>
    %75 = vector.shape_cast %72 : vector<18x1xf32> to vector<1x18x1xf32>
    tpu.vector_store %arg6[%c3_72, %c0_73, %c0_74], %75 {strides = array<i32>} : memref<4x18x18xf32, #tpu.memory_space<vmem>>, vector<1x18x1xf32>,
    %cst_75 = arith.constant 0.000000e+00 : f32
    %76 = vector.broadcast %cst_75 : f32 to vector<18x1xf32>
    %c3_76 = arith.constant 3 : index
    %c0_77 = arith.constant 0 : index
    %c17_78 = arith.constant 17 : index
    %77 = vector.load %arg6[%c3_76, %c0_77, %c17_78] : memref<4x18x18xf32, #tpu.memory_space<vmem>>, vector<1x18x1xf32>
    %78 = vector.shape_cast %77 : vector<1x18x1xf32> to vector<18x1xf32>
    %79 = vector.shape_cast %76 : vector<18x1xf32> to vector<1x18x1xf32>
    tpu.vector_store %arg6[%c3_76, %c0_77, %c17_78], %79 {strides = array<i32>} : memref<4x18x18xf32, #tpu.memory_space<vmem>>, vector<1x18x1xf32>,
    %c0_79 = arith.constant 0 : index
    %c3_80 = arith.constant 3 : index
    %c0_81 = arith.constant 0 : index
    %c0_82 = arith.constant 0 : index
    %80 = vector.load %arg2[%c0_79, %c3_80, %c0_81, %c0_82] : memref<1x4x16x16xf32, #tpu.memory_space<vmem>>, vector<1x1x16x16xf32>
    %81 = vector.shape_cast %80 : vector<1x1x16x16xf32> to vector<16x16xf32>
    %c3_83 = arith.constant 3 : index
    %c1_84 = arith.constant 1 : index
    %c1_85 = arith.constant 1 : index
    %82 = vector.load %arg6[%c3_83, %c1_84, %c1_85] : memref<4x18x18xf32, #tpu.memory_space<vmem>>, vector<1x16x16xf32>
    %83 = vector.shape_cast %82 : vector<1x16x16xf32> to vector<16x16xf32>
    %84 = vector.shape_cast %81 : vector<16x16xf32> to vector<1x16x16xf32>
    tpu.vector_store %arg6[%c3_83, %c1_84, %c1_85], %84 {strides = array<i32>} : memref<4x18x18xf32, #tpu.memory_space<vmem>>, vector<1x16x16xf32>,
    %c0_i32 = arith.constant 0 : i32
    %85 = arith.addi %0, %c0_i32 : i32
    %c9_i32 = arith.constant 9 : i32
    %86 = arith.muli %85, %c9_i32 : i32
    %c0_86 = arith.constant 0 : index
    %c0_87 = arith.constant 0 : index
    %c0_88 = arith.constant 0 : index
    %87 = vector.load %arg6[%c0_86, %c0_87, %c0_88] : memref<4x18x18xf32, #tpu.memory_space<vmem>>, vector<1x16x16xf32>
    %88 = vector.shape_cast %87 : vector<1x16x16xf32> to vector<16x16xf32>
    %89 = arith.index_cast %86 : i32 to index
    %90 = memref.load %arg3[%89] : memref<36xf32, #tpu.memory_space<smem>>
    %91 = vector.broadcast %90 : f32 to vector<16x16xf32>
    %92 = arith.mulf %88, %91 : vector<16x16xf32>
    %93 = arith.index_cast %85 : i32 to index
    %94 = memref.load %arg4[%93] : memref<4xf32, #tpu.memory_space<smem>>
    %95 = vector.broadcast %94 : f32 to vector<16x16xf32>
    %96 = arith.addf %92, %95 : vector<16x16xf32>
    %c0_89 = arith.constant 0 : index
    %c0_90 = arith.constant 0 : index
    %c1_91 = arith.constant 1 : index
    %97 = vector.load %arg6[%c0_89, %c0_90, %c1_91] : memref<4x18x18xf32, #tpu.memory_space<vmem>>, vector<1x16x16xf32>
    %98 = vector.shape_cast %97 : vector<1x16x16xf32> to vector<16x16xf32>
    %c0_i32_92 = arith.constant 0 : i32
    %99 = arith.addi %86, %c0_i32_92 : i32
    %c1_i32 = arith.constant 1 : i32
    %100 = arith.addi %99, %c1_i32 : i32
    %101 = arith.index_cast %100 : i32 to index
    %102 = memref.load %arg3[%101] : memref<36xf32, #tpu.memory_space<smem>>
    %103 = vector.broadcast %102 : f32 to vector<16x16xf32>
    %104 = arith.mulf %98, %103 : vector<16x16xf32>
    %105 = arith.addf %96, %104 : vector<16x16xf32>
    %c0_93 = arith.constant 0 : index
    %c0_94 = arith.constant 0 : index
    %c2_95 = arith.constant 2 : index
    %106 = vector.load %arg6[%c0_93, %c0_94, %c2_95] : memref<4x18x18xf32, #tpu.memory_space<vmem>>, vector<1x16x16xf32>
    %107 = vector.shape_cast %106 : vector<1x16x16xf32> to vector<16x16xf32>
    %c0_i32_96 = arith.constant 0 : i32
    %108 = arith.addi %86, %c0_i32_96 : i32
    %c2_i32 = arith.constant 2 : i32
    %109 = arith.addi %108, %c2_i32 : i32
    %110 = arith.index_cast %109 : i32 to index
    %111 = memref.load %arg3[%110] : memref<36xf32, #tpu.memory_space<smem>>
    %112 = vector.broadcast %111 : f32 to vector<16x16xf32>
    %113 = arith.mulf %107, %112 : vector<16x16xf32>
    %114 = arith.addf %105, %113 : vector<16x16xf32>
    %c0_97 = arith.constant 0 : index
    %c1_98 = arith.constant 1 : index
    %c0_99 = arith.constant 0 : index
    %115 = vector.load %arg6[%c0_97, %c1_98, %c0_99] : memref<4x18x18xf32, #tpu.memory_space<vmem>>, vector<1x16x16xf32>
    %116 = vector.shape_cast %115 : vector<1x16x16xf32> to vector<16x16xf32>
    %c3_i32 = arith.constant 3 : i32
    %117 = arith.addi %86, %c3_i32 : i32
    %c0_i32_100 = arith.constant 0 : i32
    %118 = arith.addi %117, %c0_i32_100 : i32
    %119 = arith.index_cast %118 : i32 to index
    %120 = memref.load %arg3[%119] : memref<36xf32, #tpu.memory_space<smem>>
    %121 = vector.broadcast %120 : f32 to vector<16x16xf32>
    %122 = arith.mulf %116, %121 : vector<16x16xf32>
    %123 = arith.addf %114, %122 : vector<16x16xf32>
    %c0_101 = arith.constant 0 : index
    %c1_102 = arith.constant 1 : index
    %c1_103 = arith.constant 1 : index
    %124 = vector.load %arg6[%c0_101, %c1_102, %c1_103] : memref<4x18x18xf32, #tpu.memory_space<vmem>>, vector<1x16x16xf32>
    %125 = vector.shape_cast %124 : vector<1x16x16xf32> to vector<16x16xf32>
    %c3_i32_104 = arith.constant 3 : i32
    %126 = arith.addi %86, %c3_i32_104 : i32
    %c1_i32_105 = arith.constant 1 : i32
    %127 = arith.addi %126, %c1_i32_105 : i32
    %128 = arith.index_cast %127 : i32 to index
    %129 = memref.load %arg3[%128] : memref<36xf32, #tpu.memory_space<smem>>
    %130 = vector.broadcast %129 : f32 to vector<16x16xf32>
    %131 = arith.mulf %125, %130 : vector<16x16xf32>
    %132 = arith.addf %123, %131 : vector<16x16xf32>
    %c0_106 = arith.constant 0 : index
    %c1_107 = arith.constant 1 : index
    %c2_108 = arith.constant 2 : index
    %133 = vector.load %arg6[%c0_106, %c1_107, %c2_108] : memref<4x18x18xf32, #tpu.memory_space<vmem>>, vector<1x16x16xf32>
    %134 = vector.shape_cast %133 : vector<1x16x16xf32> to vector<16x16xf32>
    %c3_i32_109 = arith.constant 3 : i32
    %135 = arith.addi %86, %c3_i32_109 : i32
    %c2_i32_110 = arith.constant 2 : i32
    %136 = arith.addi %135, %c2_i32_110 : i32
    %137 = arith.index_cast %136 : i32 to index
    %138 = memref.load %arg3[%137] : memref<36xf32, #tpu.memory_space<smem>>
    %139 = vector.broadcast %138 : f32 to vector<16x16xf32>
    %140 = arith.mulf %134, %139 : vector<16x16xf32>
    %141 = arith.addf %132, %140 : vector<16x16xf32>
    %c0_111 = arith.constant 0 : index
    %c2_112 = arith.constant 2 : index
    %c0_113 = arith.constant 0 : index
    %142 = vector.load %arg6[%c0_111, %c2_112, %c0_113] : memref<4x18x18xf32, #tpu.memory_space<vmem>>, vector<1x16x16xf32>
    %143 = vector.shape_cast %142 : vector<1x16x16xf32> to vector<16x16xf32>
    %c6_i32 = arith.constant 6 : i32
    %144 = arith.addi %86, %c6_i32 : i32
    %c0_i32_114 = arith.constant 0 : i32
    %145 = arith.addi %144, %c0_i32_114 : i32
    %146 = arith.index_cast %145 : i32 to index
    %147 = memref.load %arg3[%146] : memref<36xf32, #tpu.memory_space<smem>>
    %148 = vector.broadcast %147 : f32 to vector<16x16xf32>
    %149 = arith.mulf %143, %148 : vector<16x16xf32>
    %150 = arith.addf %141, %149 : vector<16x16xf32>
    %c0_115 = arith.constant 0 : index
    %c2_116 = arith.constant 2 : index
    %c1_117 = arith.constant 1 : index
    %151 = vector.load %arg6[%c0_115, %c2_116, %c1_117] : memref<4x18x18xf32, #tpu.memory_space<vmem>>, vector<1x16x16xf32>
    %152 = vector.shape_cast %151 : vector<1x16x16xf32> to vector<16x16xf32>
    %c6_i32_118 = arith.constant 6 : i32
    %153 = arith.addi %86, %c6_i32_118 : i32
    %c1_i32_119 = arith.constant 1 : i32
    %154 = arith.addi %153, %c1_i32_119 : i32
    %155 = arith.index_cast %154 : i32 to index
    %156 = memref.load %arg3[%155] : memref<36xf32, #tpu.memory_space<smem>>
    %157 = vector.broadcast %156 : f32 to vector<16x16xf32>
    %158 = arith.mulf %152, %157 : vector<16x16xf32>
    %159 = arith.addf %150, %158 : vector<16x16xf32>
    %c0_120 = arith.constant 0 : index
    %c2_121 = arith.constant 2 : index
    %c2_122 = arith.constant 2 : index
    %160 = vector.load %arg6[%c0_120, %c2_121, %c2_122] : memref<4x18x18xf32, #tpu.memory_space<vmem>>, vector<1x16x16xf32>
    %161 = vector.shape_cast %160 : vector<1x16x16xf32> to vector<16x16xf32>
    %c6_i32_123 = arith.constant 6 : i32
    %162 = arith.addi %86, %c6_i32_123 : i32
    %c2_i32_124 = arith.constant 2 : i32
    %163 = arith.addi %162, %c2_i32_124 : i32
    %164 = arith.index_cast %163 : i32 to index
    %165 = memref.load %arg3[%164] : memref<36xf32, #tpu.memory_space<smem>>
    %166 = vector.broadcast %165 : f32 to vector<16x16xf32>
    %167 = arith.mulf %161, %166 : vector<16x16xf32>
    %168 = arith.addf %159, %167 : vector<16x16xf32>
    %c0_125 = arith.constant 0 : index
    %c0_126 = arith.constant 0 : index
    %c0_127 = arith.constant 0 : index
    %c0_128 = arith.constant 0 : index
    %169 = vector.load %arg5[%c0_125, %c0_126, %c0_127, %c0_128] : memref<1x4x16x16xf32, #tpu.memory_space<vmem>>, vector<1x1x16x16xf32>
    %170 = vector.shape_cast %169 : vector<1x1x16x16xf32> to vector<16x16xf32>
    %171 = vector.shape_cast %168 : vector<16x16xf32> to vector<1x1x16x16xf32>
    tpu.vector_store %arg5[%c0_125, %c0_126, %c0_127, %c0_128], %171 {strides = array<i32>} : memref<1x4x16x16xf32, #tpu.memory_space<vmem>>, vector<1x1x16x16xf32>,
    %c1_i32_129 = arith.constant 1 : i32
    %172 = arith.addi %0, %c1_i32_129 : i32
    %c9_i32_130 = arith.constant 9 : i32
    %173 = arith.muli %172, %c9_i32_130 : i32
    %c1_131 = arith.constant 1 : index
    %c0_132 = arith.constant 0 : index
    %c0_133 = arith.constant 0 : index
    %174 = vector.load %arg6[%c1_131, %c0_132, %c0_133] : memref<4x18x18xf32, #tpu.memory_space<vmem>>, vector<1x16x16xf32>
    %175 = vector.shape_cast %174 : vector<1x16x16xf32> to vector<16x16xf32>
    %176 = arith.index_cast %173 : i32 to index
    %177 = memref.load %arg3[%176] : memref<36xf32, #tpu.memory_space<smem>>
    %178 = vector.broadcast %177 : f32 to vector<16x16xf32>
    %179 = arith.mulf %175, %178 : vector<16x16xf32>
    %180 = arith.index_cast %172 : i32 to index
    %181 = memref.load %arg4[%180] : memref<4xf32, #tpu.memory_space<smem>>
    %182 = vector.broadcast %181 : f32 to vector<16x16xf32>
    %183 = arith.addf %179, %182 : vector<16x16xf32>
    %c1_134 = arith.constant 1 : index
    %c0_135 = arith.constant 0 : index
    %c1_136 = arith.constant 1 : index
    %184 = vector.load %arg6[%c1_134, %c0_135, %c1_136] : memref<4x18x18xf32, #tpu.memory_space<vmem>>, vector<1x16x16xf32>
    %185 = vector.shape_cast %184 : vector<1x16x16xf32> to vector<16x16xf32>
    %c0_i32_137 = arith.constant 0 : i32
    %186 = arith.addi %173, %c0_i32_137 : i32
    %c1_i32_138 = arith.constant 1 : i32
    %187 = arith.addi %186, %c1_i32_138 : i32
    %188 = arith.index_cast %187 : i32 to index
    %189 = memref.load %arg3[%188] : memref<36xf32, #tpu.memory_space<smem>>
    %190 = vector.broadcast %189 : f32 to vector<16x16xf32>
    %191 = arith.mulf %185, %190 : vector<16x16xf32>
    %192 = arith.addf %183, %191 : vector<16x16xf32>
    %c1_139 = arith.constant 1 : index
    %c0_140 = arith.constant 0 : index
    %c2_141 = arith.constant 2 : index
    %193 = vector.load %arg6[%c1_139, %c0_140, %c2_141] : memref<4x18x18xf32, #tpu.memory_space<vmem>>, vector<1x16x16xf32>
    %194 = vector.shape_cast %193 : vector<1x16x16xf32> to vector<16x16xf32>
    %c0_i32_142 = arith.constant 0 : i32
    %195 = arith.addi %173, %c0_i32_142 : i32
    %c2_i32_143 = arith.constant 2 : i32
    %196 = arith.addi %195, %c2_i32_143 : i32
    %197 = arith.index_cast %196 : i32 to index
    %198 = memref.load %arg3[%197] : memref<36xf32, #tpu.memory_space<smem>>
    %199 = vector.broadcast %198 : f32 to vector<16x16xf32>
    %200 = arith.mulf %194, %199 : vector<16x16xf32>
    %201 = arith.addf %192, %200 : vector<16x16xf32>
    %c1_144 = arith.constant 1 : index
    %c1_145 = arith.constant 1 : index
    %c0_146 = arith.constant 0 : index
    %202 = vector.load %arg6[%c1_144, %c1_145, %c0_146] : memref<4x18x18xf32, #tpu.memory_space<vmem>>, vector<1x16x16xf32>
    %203 = vector.shape_cast %202 : vector<1x16x16xf32> to vector<16x16xf32>
    %c3_i32_147 = arith.constant 3 : i32
    %204 = arith.addi %173, %c3_i32_147 : i32
    %c0_i32_148 = arith.constant 0 : i32
    %205 = arith.addi %204, %c0_i32_148 : i32
    %206 = arith.index_cast %205 : i32 to index
    %207 = memref.load %arg3[%206] : memref<36xf32, #tpu.memory_space<smem>>
    %208 = vector.broadcast %207 : f32 to vector<16x16xf32>
    %209 = arith.mulf %203, %208 : vector<16x16xf32>
    %210 = arith.addf %201, %209 : vector<16x16xf32>
    %c1_149 = arith.constant 1 : index
    %c1_150 = arith.constant 1 : index
    %c1_151 = arith.constant 1 : index
    %211 = vector.load %arg6[%c1_149, %c1_150, %c1_151] : memref<4x18x18xf32, #tpu.memory_space<vmem>>, vector<1x16x16xf32>
    %212 = vector.shape_cast %211 : vector<1x16x16xf32> to vector<16x16xf32>
    %c3_i32_152 = arith.constant 3 : i32
    %213 = arith.addi %173, %c3_i32_152 : i32
    %c1_i32_153 = arith.constant 1 : i32
    %214 = arith.addi %213, %c1_i32_153 : i32
    %215 = arith.index_cast %214 : i32 to index
    %216 = memref.load %arg3[%215] : memref<36xf32, #tpu.memory_space<smem>>
    %217 = vector.broadcast %216 : f32 to vector<16x16xf32>
    %218 = arith.mulf %212, %217 : vector<16x16xf32>
    %219 = arith.addf %210, %218 : vector<16x16xf32>
    %c1_154 = arith.constant 1 : index
    %c1_155 = arith.constant 1 : index
    %c2_156 = arith.constant 2 : index
    %220 = vector.load %arg6[%c1_154, %c1_155, %c2_156] : memref<4x18x18xf32, #tpu.memory_space<vmem>>, vector<1x16x16xf32>
    %221 = vector.shape_cast %220 : vector<1x16x16xf32> to vector<16x16xf32>
    %c3_i32_157 = arith.constant 3 : i32
    %222 = arith.addi %173, %c3_i32_157 : i32
    %c2_i32_158 = arith.constant 2 : i32
    %223 = arith.addi %222, %c2_i32_158 : i32
    %224 = arith.index_cast %223 : i32 to index
    %225 = memref.load %arg3[%224] : memref<36xf32, #tpu.memory_space<smem>>
    %226 = vector.broadcast %225 : f32 to vector<16x16xf32>
    %227 = arith.mulf %221, %226 : vector<16x16xf32>
    %228 = arith.addf %219, %227 : vector<16x16xf32>
    %c1_159 = arith.constant 1 : index
    %c2_160 = arith.constant 2 : index
    %c0_161 = arith.constant 0 : index
    %229 = vector.load %arg6[%c1_159, %c2_160, %c0_161] : memref<4x18x18xf32, #tpu.memory_space<vmem>>, vector<1x16x16xf32>
    %230 = vector.shape_cast %229 : vector<1x16x16xf32> to vector<16x16xf32>
    %c6_i32_162 = arith.constant 6 : i32
    %231 = arith.addi %173, %c6_i32_162 : i32
    %c0_i32_163 = arith.constant 0 : i32
    %232 = arith.addi %231, %c0_i32_163 : i32
    %233 = arith.index_cast %232 : i32 to index
    %234 = memref.load %arg3[%233] : memref<36xf32, #tpu.memory_space<smem>>
    %235 = vector.broadcast %234 : f32 to vector<16x16xf32>
    %236 = arith.mulf %230, %235 : vector<16x16xf32>
    %237 = arith.addf %228, %236 : vector<16x16xf32>
    %c1_164 = arith.constant 1 : index
    %c2_165 = arith.constant 2 : index
    %c1_166 = arith.constant 1 : index
    %238 = vector.load %arg6[%c1_164, %c2_165, %c1_166] : memref<4x18x18xf32, #tpu.memory_space<vmem>>, vector<1x16x16xf32>
    %239 = vector.shape_cast %238 : vector<1x16x16xf32> to vector<16x16xf32>
    %c6_i32_167 = arith.constant 6 : i32
    %240 = arith.addi %173, %c6_i32_167 : i32
    %c1_i32_168 = arith.constant 1 : i32
    %241 = arith.addi %240, %c1_i32_168 : i32
    %242 = arith.index_cast %241 : i32 to index
    %243 = memref.load %arg3[%242] : memref<36xf32, #tpu.memory_space<smem>>
    %244 = vector.broadcast %243 : f32 to vector<16x16xf32>
    %245 = arith.mulf %239, %244 : vector<16x16xf32>
    %246 = arith.addf %237, %245 : vector<16x16xf32>
    %c1_169 = arith.constant 1 : index
    %c2_170 = arith.constant 2 : index
    %c2_171 = arith.constant 2 : index
    %247 = vector.load %arg6[%c1_169, %c2_170, %c2_171] : memref<4x18x18xf32, #tpu.memory_space<vmem>>, vector<1x16x16xf32>
    %248 = vector.shape_cast %247 : vector<1x16x16xf32> to vector<16x16xf32>
    %c6_i32_172 = arith.constant 6 : i32
    %249 = arith.addi %173, %c6_i32_172 : i32
    %c2_i32_173 = arith.constant 2 : i32
    %250 = arith.addi %249, %c2_i32_173 : i32
    %251 = arith.index_cast %250 : i32 to index
    %252 = memref.load %arg3[%251] : memref<36xf32, #tpu.memory_space<smem>>
    %253 = vector.broadcast %252 : f32 to vector<16x16xf32>
    %254 = arith.mulf %248, %253 : vector<16x16xf32>
    %255 = arith.addf %246, %254 : vector<16x16xf32>
    %c0_174 = arith.constant 0 : index
    %c1_175 = arith.constant 1 : index
    %c0_176 = arith.constant 0 : index
    %c0_177 = arith.constant 0 : index
    %256 = vector.load %arg5[%c0_174, %c1_175, %c0_176, %c0_177] : memref<1x4x16x16xf32, #tpu.memory_space<vmem>>, vector<1x1x16x16xf32>
    %257 = vector.shape_cast %256 : vector<1x1x16x16xf32> to vector<16x16xf32>
    %258 = vector.shape_cast %255 : vector<16x16xf32> to vector<1x1x16x16xf32>
    tpu.vector_store %arg5[%c0_174, %c1_175, %c0_176, %c0_177], %258 {strides = array<i32>} : memref<1x4x16x16xf32, #tpu.memory_space<vmem>>, vector<1x1x16x16xf32>,
    %c2_i32_178 = arith.constant 2 : i32
    %259 = arith.addi %0, %c2_i32_178 : i32
    %c9_i32_179 = arith.constant 9 : i32
    %260 = arith.muli %259, %c9_i32_179 : i32
    %c2_180 = arith.constant 2 : index
    %c0_181 = arith.constant 0 : index
    %c0_182 = arith.constant 0 : index
    %261 = vector.load %arg6[%c2_180, %c0_181, %c0_182] : memref<4x18x18xf32, #tpu.memory_space<vmem>>, vector<1x16x16xf32>
    %262 = vector.shape_cast %261 : vector<1x16x16xf32> to vector<16x16xf32>
    %263 = arith.index_cast %260 : i32 to index
    %264 = memref.load %arg3[%263] : memref<36xf32, #tpu.memory_space<smem>>
    %265 = vector.broadcast %264 : f32 to vector<16x16xf32>
    %266 = arith.mulf %262, %265 : vector<16x16xf32>
    %267 = arith.index_cast %259 : i32 to index
    %268 = memref.load %arg4[%267] : memref<4xf32, #tpu.memory_space<smem>>
    %269 = vector.broadcast %268 : f32 to vector<16x16xf32>
    %270 = arith.addf %266, %269 : vector<16x16xf32>
    %c2_183 = arith.constant 2 : index
    %c0_184 = arith.constant 0 : index
    %c1_185 = arith.constant 1 : index
    %271 = vector.load %arg6[%c2_183, %c0_184, %c1_185] : memref<4x18x18xf32, #tpu.memory_space<vmem>>, vector<1x16x16xf32>
    %272 = vector.shape_cast %271 : vector<1x16x16xf32> to vector<16x16xf32>
    %c0_i32_186 = arith.constant 0 : i32
    %273 = arith.addi %260, %c0_i32_186 : i32
    %c1_i32_187 = arith.constant 1 : i32
    %274 = arith.addi %273, %c1_i32_187 : i32
    %275 = arith.index_cast %274 : i32 to index
    %276 = memref.load %arg3[%275] : memref<36xf32, #tpu.memory_space<smem>>
    %277 = vector.broadcast %276 : f32 to vector<16x16xf32>
    %278 = arith.mulf %272, %277 : vector<16x16xf32>
    %279 = arith.addf %270, %278 : vector<16x16xf32>
    %c2_188 = arith.constant 2 : index
    %c0_189 = arith.constant 0 : index
    %c2_190 = arith.constant 2 : index
    %280 = vector.load %arg6[%c2_188, %c0_189, %c2_190] : memref<4x18x18xf32, #tpu.memory_space<vmem>>, vector<1x16x16xf32>
    %281 = vector.shape_cast %280 : vector<1x16x16xf32> to vector<16x16xf32>
    %c0_i32_191 = arith.constant 0 : i32
    %282 = arith.addi %260, %c0_i32_191 : i32
    %c2_i32_192 = arith.constant 2 : i32
    %283 = arith.addi %282, %c2_i32_192 : i32
    %284 = arith.index_cast %283 : i32 to index
    %285 = memref.load %arg3[%284] : memref<36xf32, #tpu.memory_space<smem>>
    %286 = vector.broadcast %285 : f32 to vector<16x16xf32>
    %287 = arith.mulf %281, %286 : vector<16x16xf32>
    %288 = arith.addf %279, %287 : vector<16x16xf32>
    %c2_193 = arith.constant 2 : index
    %c1_194 = arith.constant 1 : index
    %c0_195 = arith.constant 0 : index
    %289 = vector.load %arg6[%c2_193, %c1_194, %c0_195] : memref<4x18x18xf32, #tpu.memory_space<vmem>>, vector<1x16x16xf32>
    %290 = vector.shape_cast %289 : vector<1x16x16xf32> to vector<16x16xf32>
    %c3_i32_196 = arith.constant 3 : i32
    %291 = arith.addi %260, %c3_i32_196 : i32
    %c0_i32_197 = arith.constant 0 : i32
    %292 = arith.addi %291, %c0_i32_197 : i32
    %293 = arith.index_cast %292 : i32 to index
    %294 = memref.load %arg3[%293] : memref<36xf32, #tpu.memory_space<smem>>
    %295 = vector.broadcast %294 : f32 to vector<16x16xf32>
    %296 = arith.mulf %290, %295 : vector<16x16xf32>
    %297 = arith.addf %288, %296 : vector<16x16xf32>
    %c2_198 = arith.constant 2 : index
    %c1_199 = arith.constant 1 : index
    %c1_200 = arith.constant 1 : index
    %298 = vector.load %arg6[%c2_198, %c1_199, %c1_200] : memref<4x18x18xf32, #tpu.memory_space<vmem>>, vector<1x16x16xf32>
    %299 = vector.shape_cast %298 : vector<1x16x16xf32> to vector<16x16xf32>
    %c3_i32_201 = arith.constant 3 : i32
    %300 = arith.addi %260, %c3_i32_201 : i32
    %c1_i32_202 = arith.constant 1 : i32
    %301 = arith.addi %300, %c1_i32_202 : i32
    %302 = arith.index_cast %301 : i32 to index
    %303 = memref.load %arg3[%302] : memref<36xf32, #tpu.memory_space<smem>>
    %304 = vector.broadcast %303 : f32 to vector<16x16xf32>
    %305 = arith.mulf %299, %304 : vector<16x16xf32>
    %306 = arith.addf %297, %305 : vector<16x16xf32>
    %c2_203 = arith.constant 2 : index
    %c1_204 = arith.constant 1 : index
    %c2_205 = arith.constant 2 : index
    %307 = vector.load %arg6[%c2_203, %c1_204, %c2_205] : memref<4x18x18xf32, #tpu.memory_space<vmem>>, vector<1x16x16xf32>
    %308 = vector.shape_cast %307 : vector<1x16x16xf32> to vector<16x16xf32>
    %c3_i32_206 = arith.constant 3 : i32
    %309 = arith.addi %260, %c3_i32_206 : i32
    %c2_i32_207 = arith.constant 2 : i32
    %310 = arith.addi %309, %c2_i32_207 : i32
    %311 = arith.index_cast %310 : i32 to index
    %312 = memref.load %arg3[%311] : memref<36xf32, #tpu.memory_space<smem>>
    %313 = vector.broadcast %312 : f32 to vector<16x16xf32>
    %314 = arith.mulf %308, %313 : vector<16x16xf32>
    %315 = arith.addf %306, %314 : vector<16x16xf32>
    %c2_208 = arith.constant 2 : index
    %c2_209 = arith.constant 2 : index
    %c0_210 = arith.constant 0 : index
    %316 = vector.load %arg6[%c2_208, %c2_209, %c0_210] : memref<4x18x18xf32, #tpu.memory_space<vmem>>, vector<1x16x16xf32>
    %317 = vector.shape_cast %316 : vector<1x16x16xf32> to vector<16x16xf32>
    %c6_i32_211 = arith.constant 6 : i32
    %318 = arith.addi %260, %c6_i32_211 : i32
    %c0_i32_212 = arith.constant 0 : i32
    %319 = arith.addi %318, %c0_i32_212 : i32
    %320 = arith.index_cast %319 : i32 to index
    %321 = memref.load %arg3[%320] : memref<36xf32, #tpu.memory_space<smem>>
    %322 = vector.broadcast %321 : f32 to vector<16x16xf32>
    %323 = arith.mulf %317, %322 : vector<16x16xf32>
    %324 = arith.addf %315, %323 : vector<16x16xf32>
    %c2_213 = arith.constant 2 : index
    %c2_214 = arith.constant 2 : index
    %c1_215 = arith.constant 1 : index
    %325 = vector.load %arg6[%c2_213, %c2_214, %c1_215] : memref<4x18x18xf32, #tpu.memory_space<vmem>>, vector<1x16x16xf32>
    %326 = vector.shape_cast %325 : vector<1x16x16xf32> to vector<16x16xf32>
    %c6_i32_216 = arith.constant 6 : i32
    %327 = arith.addi %260, %c6_i32_216 : i32
    %c1_i32_217 = arith.constant 1 : i32
    %328 = arith.addi %327, %c1_i32_217 : i32
    %329 = arith.index_cast %328 : i32 to index
    %330 = memref.load %arg3[%329] : memref<36xf32, #tpu.memory_space<smem>>
    %331 = vector.broadcast %330 : f32 to vector<16x16xf32>
    %332 = arith.mulf %326, %331 : vector<16x16xf32>
    %333 = arith.addf %324, %332 : vector<16x16xf32>
    %c2_218 = arith.constant 2 : index
    %c2_219 = arith.constant 2 : index
    %c2_220 = arith.constant 2 : index
    %334 = vector.load %arg6[%c2_218, %c2_219, %c2_220] : memref<4x18x18xf32, #tpu.memory_space<vmem>>, vector<1x16x16xf32>
    %335 = vector.shape_cast %334 : vector<1x16x16xf32> to vector<16x16xf32>
    %c6_i32_221 = arith.constant 6 : i32
    %336 = arith.addi %260, %c6_i32_221 : i32
    %c2_i32_222 = arith.constant 2 : i32
    %337 = arith.addi %336, %c2_i32_222 : i32
    %338 = arith.index_cast %337 : i32 to index
    %339 = memref.load %arg3[%338] : memref<36xf32, #tpu.memory_space<smem>>
    %340 = vector.broadcast %339 : f32 to vector<16x16xf32>
    %341 = arith.mulf %335, %340 : vector<16x16xf32>
    %342 = arith.addf %333, %341 : vector<16x16xf32>
    %c0_223 = arith.constant 0 : index
    %c2_224 = arith.constant 2 : index
    %c0_225 = arith.constant 0 : index
    %c0_226 = arith.constant 0 : index
    %343 = vector.load %arg5[%c0_223, %c2_224, %c0_225, %c0_226] : memref<1x4x16x16xf32, #tpu.memory_space<vmem>>, vector<1x1x16x16xf32>
    %344 = vector.shape_cast %343 : vector<1x1x16x16xf32> to vector<16x16xf32>
    %345 = vector.shape_cast %342 : vector<16x16xf32> to vector<1x1x16x16xf32>
    tpu.vector_store %arg5[%c0_223, %c2_224, %c0_225, %c0_226], %345 {strides = array<i32>} : memref<1x4x16x16xf32, #tpu.memory_space<vmem>>, vector<1x1x16x16xf32>,
    %c3_i32_227 = arith.constant 3 : i32
    %346 = arith.addi %0, %c3_i32_227 : i32
    %c9_i32_228 = arith.constant 9 : i32
    %347 = arith.muli %346, %c9_i32_228 : i32
    %c3_229 = arith.constant 3 : index
    %c0_230 = arith.constant 0 : index
    %c0_231 = arith.constant 0 : index
    %348 = vector.load %arg6[%c3_229, %c0_230, %c0_231] : memref<4x18x18xf32, #tpu.memory_space<vmem>>, vector<1x16x16xf32>
    %349 = vector.shape_cast %348 : vector<1x16x16xf32> to vector<16x16xf32>
    %350 = arith.index_cast %347 : i32 to index
    %351 = memref.load %arg3[%350] : memref<36xf32, #tpu.memory_space<smem>>
    %352 = vector.broadcast %351 : f32 to vector<16x16xf32>
    %353 = arith.mulf %349, %352 : vector<16x16xf32>
    %354 = arith.index_cast %346 : i32 to index
    %355 = memref.load %arg4[%354] : memref<4xf32, #tpu.memory_space<smem>>
    %356 = vector.broadcast %355 : f32 to vector<16x16xf32>
    %357 = arith.addf %353, %356 : vector<16x16xf32>
    %c3_232 = arith.constant 3 : index
    %c0_233 = arith.constant 0 : index
    %c1_234 = arith.constant 1 : index
    %358 = vector.load %arg6[%c3_232, %c0_233, %c1_234] : memref<4x18x18xf32, #tpu.memory_space<vmem>>, vector<1x16x16xf32>
    %359 = vector.shape_cast %358 : vector<1x16x16xf32> to vector<16x16xf32>
    %c0_i32_235 = arith.constant 0 : i32
    %360 = arith.addi %347, %c0_i32_235 : i32
    %c1_i32_236 = arith.constant 1 : i32
    %361 = arith.addi %360, %c1_i32_236 : i32
    %362 = arith.index_cast %361 : i32 to index
    %363 = memref.load %arg3[%362] : memref<36xf32, #tpu.memory_space<smem>>
    %364 = vector.broadcast %363 : f32 to vector<16x16xf32>
    %365 = arith.mulf %359, %364 : vector<16x16xf32>
    %366 = arith.addf %357, %365 : vector<16x16xf32>
    %c3_237 = arith.constant 3 : index
    %c0_238 = arith.constant 0 : index
    %c2_239 = arith.constant 2 : index
    %367 = vector.load %arg6[%c3_237, %c0_238, %c2_239] : memref<4x18x18xf32, #tpu.memory_space<vmem>>, vector<1x16x16xf32>
    %368 = vector.shape_cast %367 : vector<1x16x16xf32> to vector<16x16xf32>
    %c0_i32_240 = arith.constant 0 : i32
    %369 = arith.addi %347, %c0_i32_240 : i32
    %c2_i32_241 = arith.constant 2 : i32
    %370 = arith.addi %369, %c2_i32_241 : i32
    %371 = arith.index_cast %370 : i32 to index
    %372 = memref.load %arg3[%371] : memref<36xf32, #tpu.memory_space<smem>>
    %373 = vector.broadcast %372 : f32 to vector<16x16xf32>
    %374 = arith.mulf %368, %373 : vector<16x16xf32>
    %375 = arith.addf %366, %374 : vector<16x16xf32>
    %c3_242 = arith.constant 3 : index
    %c1_243 = arith.constant 1 : index
    %c0_244 = arith.constant 0 : index
    %376 = vector.load %arg6[%c3_242, %c1_243, %c0_244] : memref<4x18x18xf32, #tpu.memory_space<vmem>>, vector<1x16x16xf32>
    %377 = vector.shape_cast %376 : vector<1x16x16xf32> to vector<16x16xf32>
    %c3_i32_245 = arith.constant 3 : i32
    %378 = arith.addi %347, %c3_i32_245 : i32
    %c0_i32_246 = arith.constant 0 : i32
    %379 = arith.addi %378, %c0_i32_246 : i32
    %380 = arith.index_cast %379 : i32 to index
    %381 = memref.load %arg3[%380] : memref<36xf32, #tpu.memory_space<smem>>
    %382 = vector.broadcast %381 : f32 to vector<16x16xf32>
    %383 = arith.mulf %377, %382 : vector<16x16xf32>
    %384 = arith.addf %375, %383 : vector<16x16xf32>
    %c3_247 = arith.constant 3 : index
    %c1_248 = arith.constant 1 : index
    %c1_249 = arith.constant 1 : index
    %385 = vector.load %arg6[%c3_247, %c1_248, %c1_249] : memref<4x18x18xf32, #tpu.memory_space<vmem>>, vector<1x16x16xf32>
    %386 = vector.shape_cast %385 : vector<1x16x16xf32> to vector<16x16xf32>
    %c3_i32_250 = arith.constant 3 : i32
    %387 = arith.addi %347, %c3_i32_250 : i32
    %c1_i32_251 = arith.constant 1 : i32
    %388 = arith.addi %387, %c1_i32_251 : i32
    %389 = arith.index_cast %388 : i32 to index
    %390 = memref.load %arg3[%389] : memref<36xf32, #tpu.memory_space<smem>>
    %391 = vector.broadcast %390 : f32 to vector<16x16xf32>
    %392 = arith.mulf %386, %391 : vector<16x16xf32>
    %393 = arith.addf %384, %392 : vector<16x16xf32>
    %c3_252 = arith.constant 3 : index
    %c1_253 = arith.constant 1 : index
    %c2_254 = arith.constant 2 : index
    %394 = vector.load %arg6[%c3_252, %c1_253, %c2_254] : memref<4x18x18xf32, #tpu.memory_space<vmem>>, vector<1x16x16xf32>
    %395 = vector.shape_cast %394 : vector<1x16x16xf32> to vector<16x16xf32>
    %c3_i32_255 = arith.constant 3 : i32
    %396 = arith.addi %347, %c3_i32_255 : i32
    %c2_i32_256 = arith.constant 2 : i32
    %397 = arith.addi %396, %c2_i32_256 : i32
    %398 = arith.index_cast %397 : i32 to index
    %399 = memref.load %arg3[%398] : memref<36xf32, #tpu.memory_space<smem>>
    %400 = vector.broadcast %399 : f32 to vector<16x16xf32>
    %401 = arith.mulf %395, %400 : vector<16x16xf32>
    %402 = arith.addf %393, %401 : vector<16x16xf32>
    %c3_257 = arith.constant 3 : index
    %c2_258 = arith.constant 2 : index
    %c0_259 = arith.constant 0 : index
    %403 = vector.load %arg6[%c3_257, %c2_258, %c0_259] : memref<4x18x18xf32, #tpu.memory_space<vmem>>, vector<1x16x16xf32>
    %404 = vector.shape_cast %403 : vector<1x16x16xf32> to vector<16x16xf32>
    %c6_i32_260 = arith.constant 6 : i32
    %405 = arith.addi %347, %c6_i32_260 : i32
    %c0_i32_261 = arith.constant 0 : i32
    %406 = arith.addi %405, %c0_i32_261 : i32
    %407 = arith.index_cast %406 : i32 to index
    %408 = memref.load %arg3[%407] : memref<36xf32, #tpu.memory_space<smem>>
    %409 = vector.broadcast %408 : f32 to vector<16x16xf32>
    %410 = arith.mulf %404, %409 : vector<16x16xf32>
    %411 = arith.addf %402, %410 : vector<16x16xf32>
    %c3_262 = arith.constant 3 : index
    %c2_263 = arith.constant 2 : index
    %c1_264 = arith.constant 1 : index
    %412 = vector.load %arg6[%c3_262, %c2_263, %c1_264] : memref<4x18x18xf32, #tpu.memory_space<vmem>>, vector<1x16x16xf32>
    %413 = vector.shape_cast %412 : vector<1x16x16xf32> to vector<16x16xf32>
    %c6_i32_265 = arith.constant 6 : i32
    %414 = arith.addi %347, %c6_i32_265 : i32
    %c1_i32_266 = arith.constant 1 : i32
    %415 = arith.addi %414, %c1_i32_266 : i32
    %416 = arith.index_cast %415 : i32 to index
    %417 = memref.load %arg3[%416] : memref<36xf32, #tpu.memory_space<smem>>
    %418 = vector.broadcast %417 : f32 to vector<16x16xf32>
    %419 = arith.mulf %413, %418 : vector<16x16xf32>
    %420 = arith.addf %411, %419 : vector<16x16xf32>
    %c3_267 = arith.constant 3 : index
    %c2_268 = arith.constant 2 : index
    %c2_269 = arith.constant 2 : index
    %421 = vector.load %arg6[%c3_267, %c2_268, %c2_269] : memref<4x18x18xf32, #tpu.memory_space<vmem>>, vector<1x16x16xf32>
    %422 = vector.shape_cast %421 : vector<1x16x16xf32> to vector<16x16xf32>
    %c6_i32_270 = arith.constant 6 : i32
    %423 = arith.addi %347, %c6_i32_270 : i32
    %c2_i32_271 = arith.constant 2 : i32
    %424 = arith.addi %423, %c2_i32_271 : i32
    %425 = arith.index_cast %424 : i32 to index
    %426 = memref.load %arg3[%425] : memref<36xf32, #tpu.memory_space<smem>>
    %427 = vector.broadcast %426 : f32 to vector<16x16xf32>
    %428 = arith.mulf %422, %427 : vector<16x16xf32>
    %429 = arith.addf %420, %428 : vector<16x16xf32>
    %c0_272 = arith.constant 0 : index
    %c3_273 = arith.constant 3 : index
    %c0_274 = arith.constant 0 : index
    %c0_275 = arith.constant 0 : index
    %430 = vector.load %arg5[%c0_272, %c3_273, %c0_274, %c0_275] : memref<1x4x16x16xf32, #tpu.memory_space<vmem>>, vector<1x1x16x16xf32>
    %431 = vector.shape_cast %430 : vector<1x1x16x16xf32> to vector<16x16xf32>
    %432 = vector.shape_cast %429 : vector<16x16xf32> to vector<1x1x16x16xf32>
    tpu.vector_store %arg5[%c0_272, %c3_273, %c0_274, %c0_275], %432 {strides = array<i32>} : memref<1x4x16x16xf32, #tpu.memory_space<vmem>>, vector<1x1x16x16xf32>,
    return
  }
  func.func @transform_0(%arg0: i32, %arg1: i32) -> (i32, i32, i32, i32) {
    %c0_i32 = arith.constant 0 : i32
    %c0_i32_0 = arith.constant 0 : i32
    %c0_i32_1 = arith.constant 0 : i32
    return %arg0, %arg1, %c0_i32, %c0_i32_0 : i32, i32, i32, i32
  }
  func.func @transform_1(%arg0: i32, %arg1: i32) -> i32 {
    %c0_i32 = arith.constant 0 : i32
    %c0_i32_0 = arith.constant 0 : i32
    return %c0_i32 : i32
  }
  func.func @transform_2(%arg0: i32, %arg1: i32) -> i32 {
    %c0_i32 = arith.constant 0 : i32
    %c0_i32_0 = arith.constant 0 : i32
    return %c0_i32 : i32
  }
  func.func @transform_3(%arg0: i32, %arg1: i32) -> (i32, i32, i32, i32) {
    %c0_i32 = arith.constant 0 : i32
    %c0_i32_0 = arith.constant 0 : i32
    %c0_i32_1 = arith.constant 0 : i32
    return %arg0, %arg1, %c0_i32, %c0_i32_0 : i32, i32, i32, i32
  }
}

</mosaic_0001>

<bundles_post_ra>
// kernel: partial_conv.1
= control target key start
LH: loop header
LB: loop body
LE: loop exit
PB: predicated region body
PF: predicated region fallthrough
CT: control target
= control target key end

     0   :  { %8 = vsyncpa [#allocation4], 0  ;;  %s1812_s0 = inlined_call_operand.hbm [shape: f32[2,4,16,16], index: 0, kind: input, shape index: {}]   ;;  %s1813_s1 = inlined_call_operand.vmem [shape: f32[36], index: 1, kind: input, shape index: {}]   ;;  %s1814_s2 = inlined_call_operand.vmem [shape: f32[4], index: 2, kind: input, shape index: {}]   ;;  %s1815_s3 = inlined_call_operand.hbm [shape: f32[2,4,16,16], index: 3, kind: output, shape index: {}]  }
   0x1   :  { %10 = vsyncpa [#allocation4 + $0x1], 0 }
   0x2   :  { %11 = vsyncpa [#allocation6], 0 }
   0x3   :  { %12 = vsyncpa [#allocation9], 0 }
   0x4   :  { %13 = vsyncpa [#allocation5], 0 }
   0x5   :  { %15 = vsyncpa [#allocation5 + $0x1], 0  ;;  %s1293_s12 = smov 0   ;;  %s1295_s13 = smov 0  }
   0x6   :  { %s1297_s14 = smov 0   ;;  %s1299_s15 = smov 0  }
   0x7   :  { %s1301_s16 = smov 0   ;;  %s1303_s17 = smov 0  }
   0x8 LB: > { %s947_s18 = sadd.s32 4294967295, %s1259_s17   ;;  %s948_s19 = sadd.s32 4294967294, %s1259_s17   ;;  %s1259_s17 = sphi %s1303_s17, %s21_s17   ;;  %s1255_s16 = sphi %s1301_s16, %s1841_s16   ;;  %s1251_s15 = sphi %s1299_s15, %s1840_s15   ;;  %s1247_s14 = sphi %s1297_s14, %s1839_s14   ;;  %s1243_s13 = sphi %s1295_s13, %s1838_s13   ;;  %s1239_s12 = sphi %s1293_s12, %s1837_s12  }
   0x9   : > { %s42_s20 = sadd.s32 1, %s1247_s14  ;;  %p49_p0 = scmp.ne.s32.totalorder %s1247_s14, %s1243_s13 }
   0xa   : > { %p50_p1 = scmp.eq.s32.totalorder %s1259_s17, 0  ;;  %p55_p2 = scmp.ne.s32.totalorder %s1243_s13, %s1239_s12 }
   0xb   : > { %p1331_p3 = scmp.eq.s32.totalorder %s947_s18, 0  ;;  %p123_p4 = scmp.eq.s32.totalorder %s947_s18, 1 }
   0xc   : > { %p1335_p5 = por %p50_p1, %p49_p0  ;;  %p129_p6 = scmp.eq.s32.totalorder %s948_s19, 1 }
   0xd   : > { %s1822_s21 = scalar_select %p1331_p3, 1, 0 }
   0xe   : > { %p1341_p7 = por %p1331_p3, %p55_p2  ;;  %p1345_p8 = por %p123_p4, %p49_p0 }
   0xf   : > { %p1349_p9 = por %p129_p6, %p55_p2  ;;  %p949_p10 = scmp.ge.s32.totalorder %s1259_s17, 1 }
  0x10   : > { %s1824_s23 = scalar_select %p1341_p7, 1, 0 }
  0x11   : > { %s1825_s24 = scalar_select %p1345_p8, 1, 0 }
  0x12   : > { %s1826_s25 = scalar_select %p1349_p9, 1, 0 }
  0x13   : > { %p136_p11 = scmp.lt.s32.totalorder %s1259_s17, 3  ;;  %s149_s28 = sshll.u32 %s1813_s1, 4  ;;  %s150_s28 = int_to_ptr.vmem [resolvable:$true] %s149_s28 }
  0x14   : > { %p1047_p0 = scmp.lt.s32.totalorder %s1259_s17, 2  ;;  %s160_s5 = sshll.u32 %s1814_s2, 4  ;;  %s161_s5 = int_to_ptr.vmem [resolvable:$true] %s160_s5 }
  0x15   : > { %p1358_p12 = pnand %p949_p10, %p136_p11  ;;  %s1109_s8 = scalar_lea.vmem %s150_s28, 16 }
  0x16   : > { %p1371_p2 = pnand %p1047_p0, %p1335_p5  ;;  %p1110_p6 = scmp.ne.s32.totalorder %s150_s28, %s1109_s8 }
  0x17   : > { %s1827_s29 = scalar_select %p1358_p12, 1, 0 }
  0x18   : > { %p1030_p1 = pneg %p1358_p12  ;;  %p1117_p9 = scmp.lt.s32.totalorder %s150_s28, %s150_s28 }
  0x19   : > { %s1828_s6 = scalar_select %p1371_p2, 1, 0 }
  0x1a   : > { %p1377_p4 = pnand %p1030_p1, %p1331_p3  ;;  %p1118_p8 = scmp.lt.s32.totalorder %s1109_s8, %s1109_s8 }
  0x1c   : > { %p1111_p10 = pneg %p1377_p4  ;;  %p1119_p7 = por %p1118_p8, %p1117_p9 }
  0x1e   : > { %p1112_p11 = pnand %p1111_p10, %p1110_p6 }
  0x20   : > { %p1113_p13 = pneg %p1112_p11 }
  0x22   : > { %p1120_p5 = pnand %p1119_p7, %p1113_p13 }
  0x24   : > { %1123 = shalt.err (!%p1120_p5)
}
  0x25   : > { %s1261_s9 = smov [#allocation7]   ;;  %s1124_s10 = scalar_lea.vmem %s161_s5, 16 }
  0x26   : > { %1033 = dma.vmem_to_smem (!%p1377_p4), %s150_s28, 16, %s1261_s9, [#allocation6]  }
  0x27   : > { %p1125_p0 = scmp.ne.s32.totalorder %s161_s5, %s1124_s10  ;;  %p1132_p12 = scmp.lt.s32.totalorder %s161_s5, %s161_s5 }
  0x28   : > { %p1133_p2 = scmp.lt.s32.totalorder %s1124_s10, %s1124_s10 }
  0x29   : > { %p1127_p1 = pnand %p1125_p0, %p1111_p10 }
  0x2a   : > { %p1134_p6 = por %p1133_p2, %p1132_p12 }
  0x2b   : > { %p1128_p3 = pneg %p1127_p1 }
  0x2d   : > { %p1135_p11 = pnand %p1134_p6, %p1128_p3 }
  0x2f   : > { %1138 = shalt.err (!%p1135_p11)
}
  0x30   : > { %s1262_s11 = smov [#allocation8]   ;;  %s33_s18 = sadd.s32 1, %s1255_s16 }
  0x31   : > { %1036 = dma.vmem_to_smem (!%p1377_p4), %s161_s5, 16, %s1262_s11, [#allocation9]  }
  0x32   : > { %s171_s19 = sand.u32 1, %s1247_s14   ;;  %p35_p7 = scmp.ge.s32.totalorder %s33_s18, 2 }
  0x33   : > { %s953_s22 = sshll.u32 %s171_s19, 6  ;;  %s1016_s26 = sshll.u32 %s1255_s16, 10 }
  0x34   : > { %s1843_s18 = smov (%p35_p7, %s33_s18), 0  ;;  %s1395_s30 = scalar_lea.hbm %s1812_s0, %s1016_s26 }
  0x35   : > { %s37_s4 = ssub.s32 %s1255_s16, %s1843_s18  ;;  %s175_s5 = scalar_lea.vmem [#allocation3], %s953_s22 }
  0x36   : > { %s185_s7 = sshll.u32 %s175_s5, 4  ;;  %p40_p3 = scmp.eq.s32.totalorder %s37_s4, 0  ;;  %s1399_s7 = int_to_ptr.vmem [resolvable:$true] %s185_s7 }
  0x37   : > { %s1406_s9 = scalar_lea.sflag [#allocation4], %s171_s19  ;;  %s1139_s10 = scalar_lea.hbm %s1395_s30, 1024 }
  0x38   : > { %s1404_s8 = scalar_select %p40_p3, %s1247_s14, %s42_s20  }
  0x39   : > { %p1140_p8 = scmp.ne.s32.totalorder %s1395_s30, %s1139_s10  ;;  %p1830_p9 = scmp.ne.s32.totalorder %s1828_s6, 0 }
  0x3a   : > { %s1144_s22 = scalar_lea.hbm %s1812_s0, 2048  ;;  %p1145_p4 = scmp.lt.u32.totalorder %s1395_s30, %s1812_s0 }
  0x3b   : > { %p1141_p12 = pneg %p1830_p9  ;;  %p1146_p10 = scmp.lt.u32.totalorder %s1144_s22, %s1139_s10 }
  0x3c   : > { %p1148_p0 = scmp.lt.u32.totalorder %s1139_s10, %s1395_s30 }
  0x3d   : > { %p1142_p13 = pnand %p1141_p12, %p1140_p8  ;;  %p1147_p5 = por %p1146_p10, %p1145_p4 }
  0x3f   : > { %p1143_p2 = pneg %p1142_p13  ;;  %p1149_p1 = por %p1148_p0, %p1147_p5 }
  0x41   : > { %p1150_p6 = pnand %p1149_p1, %p1143_p2 }
  0x43   : > { %1153 = shalt.err (!%p1150_p6)
}
  0x44   : > { %s1154_s20 = scalar_lea.vmem %s1399_s7, 1024  ;;  %s1263_s19 = smov [#allocation3]  }
  0x45   : > { %p1155_p11 = scmp.ne.s32.totalorder %s1399_s7, %s1154_s20  ;;  %s1159_s4 = sshll.u32 %s1263_s19, 4  ;;  %s1160_s4 = int_to_ptr.vmem [resolvable:$false] %s1159_s4 }
  0x46   : > { %s1161_s5 = scalar_lea.vmem %s1160_s4, 2048  ;;  %p1162_p8 = scmp.lt.s32.totalorder %s1399_s7, %s1160_s4 }
  0x47   : > { %p1157_p7 = pnand %p1155_p11, %p1141_p12  ;;  %p1163_p13 = scmp.lt.s32.totalorder %s1161_s5, %s1154_s20 }
  0x49   : > { %p1158_p3 = pneg %p1157_p7  ;;  %p1164_p4 = por %p1163_p13, %p1162_p8 }
  0x4b   : > { %p1165_p10 = pnand %p1164_p4, %p1158_p3 }
  0x4d   : > { %1168 = shalt.err (!%p1165_p10)
}
  0x4e   : > { %s1264_s10 = smov 128   ;;  %s1265_s11 = smov 8  }
  0x4f   : > { %1040 = dma.hbm_to_vmem [thread:$0]  (!%p1830_p9), %s1395_s30, 1024, %s1399_s7, %s1406_s9, %s1264_s10, %s1264_s10, %s1265_s11  }
  0x50   : > { %p1831_p12 = scmp.ne.s32.totalorder %s1827_s29, 0 }
  0x51   : > { %s1437_s26 = sand.u32 (!%p1831_p12), 1, %s1243_s13   ;;  %p1832_p2 = scmp.ne.s32.totalorder (!%p1831_p12), %s1824_s23, 0 }
  0x52   : > { %197 = sbr.rel (%p1831_p12) target bundleno = 451 (0x1c3), region = 32  ;;  %s957_s22 = sshll.u32 (!%p1831_p12), %s1437_s26, 6 }
  0x53   : > { %s200_s27 = scalar_lea.sflag (!%p1831_p12), [#allocation4], %s1437_s26  ;;  %s1443_s28 = scalar_lea.vmem (!%p1831_p12), [#allocation3], %s957_s22 }
  0x59   : > { %1222 = dma.done.wait (%p1832_p2), %s200_s27, 1024  }
  0x5a   : > { %1224 = vsyncadd (%p1832_p2), %s200_s27, 4294966272  ;;  %p1833_p9 = scmp.ne.s32.totalorder %s1822_s21, 0 }
  0x5c   : > { %1226 = dma.done.wait (%p1833_p9), [#allocation6], 16  }
  0x5d   : > { %1228 = vsyncadd (%p1833_p9), [#allocation6], 4294967280 }
  0x5e   : > { %1230 = dma.done.wait (%p1833_p9), [#allocation9], 16  }
  0x5f   : > { %1232 = vsyncadd (%p1833_p9), [#allocation9], 4294967280 }
  0x60   : > { %216 = sfence }
  0x61   : > { %v251_v0 = vld [vmem:[%s1443_s28] sm:$0xff]  ;;  %v961_v1 = vld [vmem:[%s1443_s28 + $0x10] sm:$0xff]  ;;  %vm238_vm0 = vcmask 139264   ;;  %s1266_s23 = smov 1   ;;  %vm241_vm1 = vcmask 7168   ;;  %vm246_vm2 = vcmask 146568  }
  0x62   : > { %255 = vrot.lane.b32.xlu0 %v251_v0, %s1266_s23  ;;  %278 = vrot.lane.b32.xlu1 %v961_v1, %s1266_s23  ;;  %vm244_vm3 = vcmask 1024   ;;  %v252_v2 = vld [vmem:[%s1443_s28 + $0x8] sm:$0xff]  ;;  %v962_v3 = vld [vmem:[%s1443_s28 + $0x18] sm:$0xff]  ;;  %v1267_v4 = vmov 0.0   ;;  %vm249_vm4 = vcmask 140424   ;;  %vm261_vm5 = vcmask 138248  }
  0x63   : > { %239 = vst.msk [vmem:[#allocation2] sm:$0x1] %vm238_vm0, %v1267_v4  ;;  %240 = vst.msk [vmem:[#allocation2 + $0x11] sm:$0x1] %vm238_vm0, %v1267_v4  ;;  %v964_v5 = vld [vmem:[%s1443_s28 + $0x28] sm:$0xff]  ;;  %v963_v6 = vld [vmem:[%s1443_s28 + $0x20] sm:$0xff] }
  0x64   : > { %243 = vst.msk [vmem:[#allocation2 + $0x8] sm:$0xff] %vm241_vm1, %v1267_v4  ;;  %268 = vst.msk [vmem:[#allocation2 + $0x20] sm:$0xff] %vm241_vm1, %v1267_v4  ;;  %v966_v7 = vld [vmem:[%s1443_s28 + $0x38] sm:$0xff]  ;;  %v965_v8 = vld [vmem:[%s1443_s28 + $0x30] sm:$0xff]  ;;  %s967_s21 = sld [smem:[#allocation7 + $0x1]]  ;;  %s1507_s29 = sld [smem:[#allocation7 + $0x2]] }
  0x65   : > { %265 = vst.msk [vmem:[#allocation2 + $0x18] sm:$0x1] %vm238_vm0, %v1267_v4  ;;  %266 = vst.msk [vmem:[#allocation2 + $0x29] sm:$0x1] %vm238_vm0, %v1267_v4  ;;  %s1511_s6 = sld [smem:[#allocation7 + $0x8]]  ;;  %s1513_s30 = sld [smem:[#allocation7 + $0x4]] }
  0x66   : > { %287 = vst.msk [vmem:[#allocation2 + $0x30] sm:$0x1] %vm238_vm0, %v1267_v4  ;;  %288 = vst.msk [vmem:[#allocation2 + $0x41] sm:$0x1] %vm238_vm0, %v1267_v4  ;;  %257 = vrot.lane.b32.xlu0 %v252_v2, %s1266_s23  ;;  %280 = vrot.lane.b32.xlu1 %v962_v3, %s1266_s23  ;;  %s1521_s7 = sld [smem:[#allocation7 + $0x5]]  ;;  %s1268_s9 = smov 127  }
  0x67   : > { %290 = vst.msk [vmem:[#allocation2 + $0x38] sm:$0xff] %vm241_vm1, %v1267_v4  ;;  %312 = vst.msk [vmem:[#allocation2 + $0x50] sm:$0xff] %vm241_vm1, %v1267_v4  ;;  %s1524_s20 = sld [smem:[#allocation7]]  ;;  %s1533_s19 = sld [smem:[#allocation7 + $0x7]]  ;;  %vm449_vm6 = vcmask 130048  }
  0x68   : > { %309 = vst.msk [vmem:[#allocation2 + $0x48] sm:$0x1] %vm238_vm0, %v1267_v4  ;;  %310 = vst.msk [vmem:[#allocation2 + $0x59] sm:$0x1] %vm238_vm0, %v1267_v4  ;;  %s1535_s4 = sld [smem:[#allocation7 + $0x6]]  ;;  %s1269_s5 = smov 126  }
  0x69   : > { %242 = vst.msk [vmem:[#allocation2] sm:$0xff] %vm241_vm1, %v1267_v4  ;;  %267 = vst.msk [vmem:[#allocation2 + $0x18] sm:$0xff] %vm241_vm1, %v1267_v4  ;;  %s1539_s10 = sld [smem:[#allocation8]]  ;;  %s1541_s11 = sld [smem:[#allocation7 + $0x3]] }
  0x6a   : > { %248 = vst.msk [vmem:[#allocation2 + $0x8] sm:$0xff] %vm246_vm2, %v1267_v4  ;;  %271 = vst.msk [vmem:[#allocation2 + $0x20] sm:$0xff] %vm246_vm2, %v1267_v4  ;;  %302 = vrot.lane.b32.xlu1 %v964_v5, %s1266_s23  ;;  %300 = vrot.lane.b32.xlu0 %v963_v6, %s1266_s23  ;;  %v343_v13 = vstv %s967_s21  ;;  %v358_v18 = vstv %s1507_s29  ;;  %s977_s27 = sld [smem:[#allocation7 + $0xa]]  ;;  %s989_s28 = sld [smem:[#allocation7 + $0x13]] }
  0x6b   : > { %245 = vst.msk [vmem:[#allocation2 + $0x10] sm:$0x3] %vm244_vm3, %v1267_v4  ;;  %269 = vst.msk [vmem:[#allocation2 + $0x28] sm:$0x3] %vm244_vm3, %v1267_v4  ;;  %v436_v25 = vstv %s1511_s6  ;;  %v382_v27 = vstv %s1513_s30  ;;  %s978_s21 = sld [smem:[#allocation7 + $0xb]]  ;;  %s990_s29 = sld [smem:[#allocation7 + $0x14]] }
  0x6c   : > { %289 = vst.msk [vmem:[#allocation2 + $0x30] sm:$0xff] %vm241_vm1, %v1267_v4  ;;  %311 = vst.msk [vmem:[#allocation2 + $0x48] sm:$0xff] %vm241_vm1, %v1267_v4  ;;  %v397_v32 = vstv %s1521_s7  ;;  %s1002_s6 = sld [smem:[#allocation7 + $0x1d]]  ;;  %s992_s7 = sld [smem:[#allocation7 + $0x16]] }
  0x6d   : > { %291 = vst.msk [vmem:[#allocation2 + $0x40] sm:$0x3] %vm244_vm3, %v1267_v4  ;;  %313 = vst.msk [vmem:[#allocation2 + $0x58] sm:$0x3] %vm244_vm3, %v1267_v4  ;;  %v334_v33 = vstv %s1524_s20  ;;  %v421_v38 = vstv %s1533_s19  ;;  %s980_s30 = sld [smem:[#allocation7 + $0xd]]  ;;  %s1004_s19 = sld [smem:[#allocation7 + $0x1f]] }
  0x6e   : > { %293 = vst.msk [vmem:[#allocation2 + $0x38] sm:$0xff] %vm246_vm2, %v1267_v4  ;;  %315 = vst.msk [vmem:[#allocation2 + $0x50] sm:$0xff] %vm246_vm2, %v1267_v4  ;;  %324 = vrot.lane.b32.xlu1 %v966_v7, %s1266_s23  ;;  %322 = vrot.lane.b32.xlu0 %v965_v8, %s1266_s23  ;;  %v414_v39 = vstv %s1535_s4  ;;  %s1001_s23 = sld [smem:[#allocation7 + $0x1c]]  ;;  %s976_s20 = sld [smem:[#allocation8 + $0x1]] }
  0x6f   : > { %247 = vst.msk [vmem:[#allocation2] sm:$0xff] %vm246_vm2, %v1267_v4  ;;  %270 = vst.msk [vmem:[#allocation2 + $0x18] sm:$0xff] %vm246_vm2, %v1267_v4  ;;  %v338_v40 = vstv %s1539_s10  ;;  %v375_v41 = vstv %s1541_s11  ;;  %s1709_s10 = scalar_lea.vmem [#allocation10], %s957_s22  ;;  %s999_s4 = sld [smem:[#allocation7 + $0x1b]] }
  0x70   : > { %250 = vst.msk [vmem:[#allocation2 + $0x10] sm:$0x3] %vm249_vm4, %v1267_v4  ;;  %272 = vst.msk [vmem:[#allocation2 + $0x28] sm:$0x3] %vm249_vm4, %v1267_v4  ;;  %v466_v48 = vstv %s977_s27  ;;  %v589_v55 = vstv %s989_s28  ;;  %s981_s27 = sld [smem:[#allocation7 + $0xe]]  ;;  %s993_s28 = sld [smem:[#allocation7 + $0x17]] }
  0x71   : > { %292 = vst.msk [vmem:[#allocation2 + $0x30] sm:$0xff] %vm246_vm2, %v1267_v4  ;;  %314 = vst.msk [vmem:[#allocation2 + $0x48] sm:$0xff] %vm246_vm2, %v1267_v4  ;;  %v481_v0 = vstv %s978_s21  ;;  %v604_v3 = vstv %s990_s29  ;;  %s983_s21 = sld [smem:[#allocation7 + $0x10]]  ;;  %s995_s29 = sld [smem:[#allocation7 + $0x19]] }
  0x72   : > { %294 = vst.msk [vmem:[#allocation2 + $0x40] sm:$0x3] %vm249_vm4, %v1267_v4  ;;  %316 = vst.msk [vmem:[#allocation2 + $0x58] sm:$0x3] %vm249_vm4, %v1267_v4  ;;  %v727_v6 = vstv %s1002_s6  ;;  %s1007_s6 = sld [smem:[#allocation7 + $0x22]]  ;;  %s979_s11 = sld [smem:[#allocation7 + $0xc]] }
  0x73   : > { %s1721_s22 = sld [smem:[#allocation7 + $0x1e]]  ;;  %p1834_p0 = scmp.ne.s32.totalorder %s1825_s24, 0 }
  0x74   : > { %v712_v60 = vstv %s1001_s23  ;;  %s1005_s23 = sld [smem:[#allocation7 + $0x20]] }
  0xd4   : > { %v256_v9 = vpop.permute.xlu0 %255  ;;  %v279_v10 = vpop.permute.xlu1 %278 }
  0xd5   : > { %262 = vst.msk [vmem:[#allocation2 + $0x1] sm:$0xff] %vm261_vm5, %v256_v9  ;;  %284 = vst.msk [vmem:[#allocation2 + $0x19] sm:$0xff] %vm261_vm5, %v279_v10  ;;  %v505_v10 = vstv %s980_s30  ;;  %s984_s30 = sld [smem:[#allocation7 + $0x11]] }
  0xd8   : > { %v258_v11 = vpop.permute.xlu0 %257  ;;  %v281_v12 = vpop.permute.xlu1 %280 }
  0xd9   : > { %263 = vst.msk [vmem:[#allocation2 + $0x9] sm:$0xff] %vm261_vm5, %v258_v11  ;;  %285 = vst.msk [vmem:[#allocation2 + $0x21] sm:$0xff] %vm261_vm5, %v281_v12 }
  0xdc   : > { %v1515_v14 = vld [vmem:[#allocation2] sm:$0xff]  ;;  %v303_v15 = vpop.permute.xlu1 %302  ;;  %v301_v16 = vpop.permute.xlu0 %300  ;;  %v1576_v47 = vld [vmem:[#allocation2 + $0x18] sm:$0xff] }
  0xdd   : > { %v344_v17 = vmul.f32 %v343_v13, %v1515_v14  ;;  %307 = vst.msk [vmem:[#allocation2 + $0x39] sm:$0xff] %vm261_vm5, %v303_v15  ;;  %306 = vst.msk [vmem:[#allocation2 + $0x31] sm:$0xff] %vm261_vm5, %v301_v16  ;;  %v359_v23 = vmul.f32 %v358_v18, %v1515_v14  ;;  %v1530_v26 = vld [vmem:[#allocation2 + $0x1] sm:$0xff]  ;;  %v467_v52 = vmul.f32 %v466_v48, %v1576_v47  ;;  %v1613_v9 = vld [vmem:[#allocation2 + $0x19] sm:$0xff]  ;;  %v628_v16 = vstv %s992_s7  ;;  %s996_s7 = sld [smem:[#allocation7 + $0x1a]] }
  0xde   : > { %v383_v30 = vmul.f32 %v382_v27, %v1530_v26  ;;  %v398_v36 = vmul.f32 %v397_v32, %v1530_v26  ;;  %v482_v1 = vmul.f32 %v481_v0, %v1576_v47  ;;  %v506_v12 = vmul.f32 %v505_v10, %v1613_v9 }
  0xdf   : > { %348 = vrot.lane.b32.xlu0 %v344_v17, %s1268_s9 }
  0xe0   : > { %v332_v19 = vld [vmem:[#allocation2 + $0x8] sm:$0xff]  ;;  %v325_v20 = vpop.permute.xlu1 %324  ;;  %v323_v21 = vpop.permute.xlu0 %322  ;;  %v1578_v49 = vld [vmem:[#allocation2 + $0x20] sm:$0xff] }
  0xe1   : > { %v345_v22 = vmul.f32 %v343_v13, %v332_v19  ;;  %v411_v24 = vld [vmem:[#allocation2 + $0xa] sm:$0xff]  ;;  %329 = vst.msk [vmem:[#allocation2 + $0x51] sm:$0xff] %vm261_vm5, %v325_v20  ;;  %328 = vst.msk [vmem:[#allocation2 + $0x49] sm:$0xff] %vm261_vm5, %v323_v21  ;;  %v360_v29 = vmul.f32 %v358_v18, %v332_v19  ;;  %v336_v34 = vmul.f32 %v334_v33, %v332_v19  ;;  %v1553_v37 = vld [vmem:[#allocation2 + $0x2] sm:$0xff]  ;;  %v751_v21 = vstv %s1004_s19  ;;  %s1008_s19 = sld [smem:[#allocation7 + $0x23]] }
  0xe2   : > { %v1543_v28 = vmul.f32 %v436_v25, %v411_v24  ;;  %v372_v31 = vld [vmem:[#allocation2 + $0x9] sm:$0xff]  ;;  %v422_v45 = vmul.f32 %v421_v38, %v1553_v37  ;;  %v1572_v46 = vmul.f32 %v414_v39, %v411_v24  ;;  %v423_v50 = vmul.f32 %v421_v38, %v411_v24  ;;  %v1615_v11 = vld [vmem:[#allocation2 + $0x21] sm:$0xff] }
  0xe3   : > { %350 = vrot.lane.b32.xlu1 %v345_v22, %s1268_s9  ;;  %363 = vrot.lane.b32.xlu0 %v359_v23, %s1269_s5  ;;  %v384_v35 = vmul.f32 %v382_v27, %v372_v31  ;;  %v1563_v42 = vadd.f32 %v338_v40, %v336_v34  ;;  %v1567_v43 = vmul.f32 %v375_v41, %v372_v31  ;;  %v766_v34 = vstv %s1005_s23  ;;  %v1649_v38 = vld [vmem:[#allocation2 + $0x1a] sm:$0xff]  ;;  %s1715_s23 = sld [smem:[#allocation7 + $0x15]] }
  0xe4   : > { %v399_v44 = vmul.f32 %v397_v32, %v372_v31  ;;  %v437_v51 = vmul.f32 %v436_v25, %v1553_v37  ;;  %v468_v53 = vmul.f32 %v466_v48, %v1578_v49  ;;  %v1585_v54 = vld [vmem:[#allocation2 + $0x30] sm:$0xff]  ;;  %v1587_v56 = vld [vmem:[#allocation2 + $0x38] sm:$0xff]  ;;  %v483_v2 = vmul.f32 %v481_v0, %v1578_v49 }
  0xe5   : > { %v590_v57 = vmul.f32 %v589_v55, %v1585_v54  ;;  %v591_v58 = vmul.f32 %v589_v55, %v1587_v56  ;;  %v605_v4 = vmul.f32 %v604_v3, %v1585_v54  ;;  %v606_v5 = vmul.f32 %v604_v3, %v1587_v56  ;;  %v1621_v15 = vld [vmem:[#allocation2 + $0x31] sm:$0xff]  ;;  %v1623_v17 = vld [vmem:[#allocation2 + $0x39] sm:$0xff] }
  0xe6   : > { %v507_v13 = vmul.f32 %v505_v10, %v1615_v11  ;;  %v629_v18 = vmul.f32 %v628_v16, %v1621_v15  ;;  %v630_v19 = vmul.f32 %v628_v16, %v1623_v17  ;;  %v520_v25 = vstv %s981_s27  ;;  %s988_s27 = sld [smem:[#allocation8 + $0x2]] }
  0xe7   : > { %365 = vrot.lane.b32.xlu1 %v360_v29, %s1269_s5  ;;  %387 = vrot.lane.b32.xlu0 %v383_v30, %s1268_s9  ;;  %v521_v27 = vmul.f32 %v520_v25, %v1613_v9  ;;  %v522_v29 = vmul.f32 %v520_v25, %v1615_v11  ;;  %v643_v30 = vstv %s993_s28  ;;  %v682_v3 = vstv %s996_s7  ;;  %s1713_s28 = sld [smem:[#allocation8 + $0x3]]  ;;  %s838_s7 = sshll.u32 %s1709_s10, 4  ;;  %s1761_s7 = int_to_ptr.vmem [resolvable:$true] %s838_s7 }
  0xe8   : > { %v1593_v59 = vld [vmem:[#allocation2 + $0x48] sm:$0xff]  ;;  %v1595_v61 = vld [vmem:[#allocation2 + $0x50] sm:$0xff]  ;;  %v644_v31 = vmul.f32 %v643_v30, %v1621_v15  ;;  %v645_v32 = vmul.f32 %v643_v30, %v1623_v17  ;;  %v335_v10 = vmul.f32 %v334_v33, %v1515_v14 }
  0xe9   : > { %v713_v62 = vmul.f32 %v712_v60, %v1593_v59  ;;  %v714_v63 = vmul.f32 %v712_v60, %v1595_v61  ;;  %v728_v7 = vmul.f32 %v727_v6, %v1593_v59  ;;  %v729_v8 = vmul.f32 %v727_v6, %v1595_v61  ;;  %v1629_v20 = vld [vmem:[#allocation2 + $0x49] sm:$0xff]  ;;  %v1631_v22 = vld [vmem:[#allocation2 + $0x51] sm:$0xff] }
  0xea   : > { %v752_v23 = vmul.f32 %v751_v21, %v1629_v20  ;;  %v753_v24 = vmul.f32 %v751_v21, %v1631_v22  ;;  %v790_v60 = vstv %s1007_s6  ;;  %v805_v6 = vstv %s1008_s19  ;;  %s1006_s6 = sld [smem:[#allocation7 + $0x21]] }
  0xeb   : > { %389 = vrot.lane.b32.xlu1 %v384_v35, %s1268_s9  ;;  %402 = vrot.lane.b32.xlu0 %v398_v36, %s1269_s5  ;;  %v767_v35 = vmul.f32 %v766_v34, %v1629_v20  ;;  %v768_v36 = vmul.f32 %v766_v34, %v1631_v22 }
  0xef   : > { %404 = vrot.lane.b32.xlu1 %v399_v44, %s1269_s5  ;;  %426 = vrot.lane.b32.xlu0 %v422_v45, %s1268_s9  ;;  %v544_v44 = vstv %s983_s21  ;;  %v1651_v45 = vld [vmem:[#allocation2 + $0x22] sm:$0xff]  ;;  %s982_s21 = sld [smem:[#allocation7 + $0xf]] }
  0xf0   : > { %v545_v48 = vmul.f32 %v544_v44, %v1649_v38 }
  0xf3   : > { %428 = vrot.lane.b32.xlu1 %v423_v50, %s1268_s9  ;;  %441 = vrot.lane.b32.xlu0 %v437_v51, %s1269_s5  ;;  %v546_v50 = vmul.f32 %v544_v44, %v1651_v45  ;;  %v1657_v51 = vld [vmem:[#allocation2 + $0x32] sm:$0xff] }
  0xf7   : > { %471 = vrot.lane.b32.xlu1 %v467_v52, %s1268_s9  ;;  %473 = vrot.lane.b32.xlu0 %v468_v53, %s1268_s9  ;;  %v667_v52 = vstv %s995_s29  ;;  %v1659_v53 = vld [vmem:[#allocation2 + $0x3a] sm:$0xff]  ;;  %s994_s29 = sld [smem:[#allocation7 + $0x18]] }
  0xf8   : > { %v668_v55 = vmul.f32 %v667_v52, %v1657_v51 }
  0xfb   : > { %594 = vrot.lane.b32.xlu1 %v590_v57, %s1268_s9  ;;  %596 = vrot.lane.b32.xlu0 %v591_v58, %s1268_s9  ;;  %v669_v57 = vmul.f32 %v667_v52, %v1659_v53  ;;  %v1665_v58 = vld [vmem:[#allocation2 + $0x4a] sm:$0xff] }
  0xff   : > { %717 = vrot.lane.b32.xlu1 %v713_v62, %s1268_s9  ;;  %719 = vrot.lane.b32.xlu0 %v714_v63, %s1268_s9  ;;  %v1667_v62 = vld [vmem:[#allocation2 + $0x52] sm:$0xff]  ;;  %v791_v63 = vmul.f32 %v790_v60, %v1665_v58 }
 0x100   : > { %v792_v0 = vmul.f32 %v790_v60, %v1667_v62 }
 0x103   : > { %486 = vrot.lane.b32.xlu1 %v482_v1, %s1269_s5  ;;  %488 = vrot.lane.b32.xlu0 %v483_v2, %s1269_s5  ;;  %v559_v1 = vstv %s984_s30  ;;  %s1017_s30 = sshll.u32 %s1251_s15, 10  ;;  %s822_s15 = scalar_lea.sflag [#allocation5], %s1437_s26 }
 0x104   : > { %v560_v2 = vmul.f32 %v559_v1, %v1649_v38 }
 0x107   : > { %609 = vrot.lane.b32.xlu1 %v605_v4, %s1269_s5  ;;  %611 = vrot.lane.b32.xlu0 %v606_v5, %s1269_s5  ;;  %v561_v4 = vmul.f32 %v559_v1, %v1651_v45  ;;  %v683_v5 = vmul.f32 %v682_v3, %v1657_v51 }
 0x10b   : > { %732 = vrot.lane.b32.xlu1 %v728_v7, %s1269_s5  ;;  %734 = vrot.lane.b32.xlu0 %v729_v8, %s1269_s5  ;;  %v684_v7 = vmul.f32 %v682_v3, %v1659_v53  ;;  %v806_v8 = vmul.f32 %v805_v6, %v1665_v58 }
 0x10f   : > { %510 = vrot.lane.b32.xlu1 %v506_v12, %s1268_s9  ;;  %512 = vrot.lane.b32.xlu0 %v507_v13, %s1268_s9  ;;  %v339_v13 = vadd.f32 %v338_v40, %v335_v10  ;;  %v584_v10 = vstv %s988_s27 }
 0x113   : > { %633 = vrot.lane.b32.xlu1 %v629_v18, %s1268_s9  ;;  %635 = vrot.lane.b32.xlu0 %v630_v19, %s1268_s9 }
 0x117   : > { %756 = vrot.lane.b32.xlu1 %v752_v23, %s1268_s9  ;;  %758 = vrot.lane.b32.xlu0 %v753_v24, %s1268_s9  ;;  %v376_v24 = vmul.f32 %v375_v41, %v1530_v26 }
 0x11b   : > { %525 = vrot.lane.b32.xlu1 %v521_v27, %s1269_s5  ;;  %527 = vrot.lane.b32.xlu0 %v522_v29, %s1269_s5 }
 0x11f   : > { %648 = vrot.lane.b32.xlu1 %v644_v31, %s1269_s5  ;;  %650 = vrot.lane.b32.xlu0 %v645_v32, %s1269_s5 }
 0x123   : > { %771 = vrot.lane.b32.xlu1 %v767_v35, %s1269_s5  ;;  %773 = vrot.lane.b32.xlu0 %v768_v36, %s1269_s5  ;;  %v415_v35 = vmul.f32 %v414_v39, %v1553_v37 }
 0x127   : > { %549 = vrot.lane.b32.xlu1 %v545_v48, %s1268_s9  ;;  %551 = vrot.lane.b32.xlu0 %v546_v50, %s1268_s9 }
 0x12b   : > { %672 = vrot.lane.b32.xlu1 %v668_v55, %s1268_s9  ;;  %674 = vrot.lane.b32.xlu0 %v669_v57, %s1268_s9 }
 0x12f   : > { %795 = vrot.lane.b32.xlu1 %v791_v63, %s1268_s9  ;;  %797 = vrot.lane.b32.xlu0 %v792_v0, %s1268_s9  ;;  %s975_s9 = sld [smem:[#allocation7 + $0x9]]  ;;  %v461_v0 = vstv %s976_s20  ;;  %s1759_s20 = scalar_lea.hbm %s1815_s3, %s1017_s30 }
 0x133   : > { %443 = vrot.lane.b32.xlu1 %v1543_v28, %s1269_s5  ;;  %564 = vrot.lane.b32.xlu0 %v560_v2, %s1269_s5  ;;  %v807_v28 = vmul.f32 %v805_v6, %v1667_v62  ;;  %v703_v2 = vstv %s999_s4  ;;  %s1270_s4 = smov [#allocation10]  }
 0x135   : > { %v457_v55 = vstv %s975_s9 }
 0x136   : > { %v458_v60 = vmul.f32 %v457_v55, %v1576_v47  ;;  %v459_v63 = vmul.f32 %v457_v55, %v1578_v49  ;;  %v621_v49 = vstv %s1715_s23 }
 0x137   : > { %566 = vrot.lane.b32.xlu1 %v561_v4, %s1269_s5  ;;  %687 = vrot.lane.b32.xlu0 %v683_v5, %s1269_s5  ;;  %v498_v5 = vstv %s979_s11  ;;  %s1173_s11 = sshll.u32 %s1270_s4, 4  ;;  %s1174_s11 = int_to_ptr.vmem [resolvable:$false] %s1173_s11 }
 0x138   : > { %v462_v6 = vadd.f32 %v461_v0, %v458_v60  ;;  %s1175_s27 = scalar_lea.vmem %s1174_s11, 2048  ;;  %p1176_p11 = scmp.lt.s32.totalorder %s1761_s7, %s1174_s11 }
 0x13b   : > { %689 = vrot.lane.b32.xlu1 %v684_v7, %s1269_s5  ;;  %810 = vrot.lane.b32.xlu0 %v806_v8, %s1269_s5  ;;  %v463_v7 = vadd.f32 %v461_v0, %v459_v63 }
 0x13f   : > { %812 = vrot.lane.b32.xlu1 %v807_v28, %s1269_s5  ;;  %s987_s5 = sld [smem:[#allocation7 + $0x12]] }
 0x145   : > { %v580_v1 = vstv %s987_s5  ;;  %s1169_s5 = scalar_lea.vmem %s1761_s7, 1024 }
 0x146   : > { %v581_v8 = vmul.f32 %v580_v1, %v1585_v54  ;;  %v582_v28 = vmul.f32 %v580_v1, %v1587_v56  ;;  %p1170_p5 = scmp.ne.s32.totalorder %s1761_s7, %s1169_s5  ;;  %p1177_p7 = scmp.lt.s32.totalorder %s1175_s27, %s1169_s5 }
 0x148   : > { %v585_v54 = vadd.f32 %v584_v10, %v581_v8  ;;  %v586_v56 = vadd.f32 %v584_v10, %v582_v28  ;;  %v660_v28 = vstv %s994_s29  ;;  %p1171_p1 = pnand %p1170_p5, %p1834_p0  ;;  %p1178_p3 = por %p1177_p7, %p1176_p11 }
 0x14a   : > { %p1172_p6 = pneg %p1171_p1 }
 0x14c   : > { %p1179_p8 = pnand %p1178_p3, %p1172_p6 }
 0x151   : > { %v349_v12 = vpop.permute.xlu0 %348 }
 0x152   : > { %v354_v16 = vadd.f32 %v349_v12, %v339_v13  ;;  %v707_v13 = vstv %s1713_s28 }
 0x155   : > { %v351_v18 = vpop.permute.xlu1 %350  ;;  %v364_v19 = vpop.permute.xlu0 %363 }
 0x156   : > { %v355_v21 = vadd.f32 %v351_v18, %v1563_v42  ;;  %v369_v23 = vadd.f32 %v364_v19, %v354_v16  ;;  %v704_v16 = vmul.f32 %v703_v2, %v1593_v59  ;;  %v705_v18 = vmul.f32 %v703_v2, %v1595_v61 }
 0x157   : > { %v622_v61 = vmul.f32 %v621_v49, %v1621_v15  ;;  %v537_v2 = vstv %s982_s21 }
 0x158   : > { %v378_v25 = vadd.f32 %v376_v24, %v369_v23  ;;  %v499_v23 = vmul.f32 %v498_v5, %v1613_v9  ;;  %v500_v24 = vmul.f32 %v498_v5, %v1615_v11  ;;  %v623_v9 = vmul.f32 %v621_v49, %v1623_v17 }
 0x159   : > { %v366_v27 = vpop.permute.xlu1 %365  ;;  %v388_v29 = vpop.permute.xlu0 %387  ;;  %v744_v11 = vstv %s1721_s22  ;;  %v539_v8 = vmul.f32 %v537_v2, %v1651_v45 }
 0x15a   : > { %v370_v30 = vadd.f32 %v366_v27, %v355_v21  ;;  %v393_v31 = vadd.f32 %v388_v29, %v378_v25  ;;  %v746_v55 = vmul.f32 %v744_v11, %v1631_v22  ;;  %v538_v22 = vmul.f32 %v537_v2, %v1649_v38 }
 0x15c   : > { %v379_v14 = vadd.f32 %v1567_v43, %v370_v30 }
 0x15d   : > { %v390_v33 = vpop.permute.xlu1 %389  ;;  %v403_v32 = vpop.permute.xlu0 %402 }
 0x15e   : > { %v394_v40 = vadd.f32 %v390_v33, %v379_v14  ;;  %v408_v34 = vadd.f32 %v403_v32, %v393_v31  ;;  %v708_v33 = vadd.f32 %v707_v13, %v704_v16 }
 0x160   : > { %v417_v42 = vadd.f32 %v415_v35, %v408_v34 }
 0x161   : > { %v405_v36 = vpop.permute.xlu1 %404  ;;  %v427_v44 = vpop.permute.xlu0 %426 }
 0x162   : > { %v409_v48 = vadd.f32 %v405_v36, %v394_v40  ;;  %v432_v26 = vadd.f32 %v427_v44, %v417_v42  ;;  %v709_v40 = vadd.f32 %v707_v13, %v705_v18 }
 0x164   : > { %v1703_v41 = vadd.f32 %v1572_v46, %v409_v48 }
 0x165   : > { %v1705_v50 = vpop.permute.xlu1 %428  ;;  %v442_v43 = vpop.permute.xlu0 %441 }
 0x166   : > { %v447_v52 = vadd.f32 %v442_v43, %v432_v26 }
 0x168   : > { %450 = vst.msk [vmem:[%s1709_s10] sm:$0xff] %vm449_vm6, %v447_v52 }
 0x169   : > { %v472_v37 = vpop.permute.xlu1 %471  ;;  %v474_v39 = vpop.permute.xlu0 %473 }
 0x16a   : > { %v477_v47 = vadd.f32 %v472_v37, %v462_v6  ;;  %v478_v12 = vadd.f32 %v474_v39, %v463_v7  ;;  %v745_v39 = vmul.f32 %v744_v11, %v1629_v20 }
 0x16d   : > { %v595_v46 = vpop.permute.xlu1 %594  ;;  %v597_v57 = vpop.permute.xlu0 %596 }
 0x16e   : > { %v600_v29 = vadd.f32 %v595_v46, %v585_v54  ;;  %v601_v30 = vadd.f32 %v597_v57, %v586_v56 }
 0x171   : > { %v718_v3 = vpop.permute.xlu1 %717  ;;  %v720_v4 = vpop.permute.xlu0 %719 }
 0x172   : > { %v723_v42 = vadd.f32 %v718_v3, %v708_v33  ;;  %v724_v36 = vadd.f32 %v720_v4, %v709_v40 }
 0x175   : > { %v487_v19 = vpop.permute.xlu1 %486  ;;  %v489_v21 = vpop.permute.xlu0 %488 }
 0x176   : > { %v492_v25 = vadd.f32 %v487_v19, %v477_v47  ;;  %v493_v27 = vadd.f32 %v489_v21, %v478_v12  ;;  %v661_v21 = vmul.f32 %v660_v28, %v1657_v51 }
 0x178   : > { %v501_v31 = vadd.f32 %v499_v23, %v492_v25  ;;  %v502_v14 = vadd.f32 %v500_v24, %v493_v27  ;;  %v662_v23 = vmul.f32 %v660_v28, %v1659_v53  ;;  %v783_v24 = vstv %s1006_s6 }
 0x179   : > { %v610_v32 = vpop.permute.xlu1 %609  ;;  %v612_v59 = vpop.permute.xlu0 %611 }
 0x17a   : > { %v615_v34 = vadd.f32 %v610_v32, %v600_v29  ;;  %v616_v35 = vadd.f32 %v612_v59, %v601_v30 }
 0x17c   : > { %v624_v44 = vadd.f32 %v622_v61, %v615_v34  ;;  %v625_v48 = vadd.f32 %v623_v9, %v616_v35  ;;  %v433_v35 = vadd.f32 %v1705_v50, %v1703_v41 }
 0x17d   : > { %v733_v26 = vpop.permute.xlu1 %732  ;;  %v735_v43 = vpop.permute.xlu0 %734 }
 0x17e   : > { %v738_v52 = vadd.f32 %v733_v26, %v723_v42  ;;  %v739_v37 = vadd.f32 %v735_v43, %v724_v36 }
 0x180   : > { %v747_v46 = vadd.f32 %v745_v39, %v738_v52  ;;  %v748_v15 = vadd.f32 %v746_v55, %v739_v37 }
 0x181   : > { %v511_v57 = vpop.permute.xlu1 %510  ;;  %v513_v60 = vpop.permute.xlu0 %512 }
 0x182   : > { %v516_v3 = vadd.f32 %v511_v57, %v501_v31  ;;  %v517_v4 = vadd.f32 %v513_v60, %v502_v14  ;;  %v784_v31 = vmul.f32 %v783_v24, %v1665_v58  ;;  %v785_v14 = vmul.f32 %v783_v24, %v1667_v62 }
 0x185   : > { %v634_v63 = vpop.permute.xlu1 %633  ;;  %v636_v17 = vpop.permute.xlu0 %635 }
 0x186   : > { %v639_v10 = vadd.f32 %v634_v63, %v624_v44  ;;  %v640_v47 = vadd.f32 %v636_v17, %v625_v48 }
 0x189   : > { %v757_v0 = vpop.permute.xlu1 %756  ;;  %v759_v1 = vpop.permute.xlu0 %758 }
 0x18a   : > { %v762_v54 = vadd.f32 %v757_v0, %v747_v46  ;;  %v763_v56 = vadd.f32 %v759_v1, %v748_v15 }
 0x18d   : > { %v526_v5 = vpop.permute.xlu1 %525  ;;  %v528_v6 = vpop.permute.xlu0 %527 }
 0x18e   : > { %v531_v7 = vadd.f32 %v526_v5, %v516_v3  ;;  %v532_v20 = vadd.f32 %v528_v6, %v517_v4 }
 0x190   : > { %v540_v12 = vadd.f32 %v538_v22, %v531_v7  ;;  %v541_v13 = vadd.f32 %v539_v8, %v532_v20 }
 0x191   : > { %v649_v49 = vpop.permute.xlu1 %648  ;;  %v651_v16 = vpop.permute.xlu0 %650 }
 0x192   : > { %v654_v18 = vadd.f32 %v649_v49, %v639_v10  ;;  %v655_v19 = vadd.f32 %v651_v16, %v640_v47 }
 0x194   : > { %v663_v25 = vadd.f32 %v661_v21, %v654_v18  ;;  %v664_v38 = vadd.f32 %v662_v23, %v655_v19 }
 0x195   : > { %v772_v27 = vpop.permute.xlu1 %771  ;;  %v774_v45 = vpop.permute.xlu0 %773 }
 0x196   : > { %v777_v29 = vadd.f32 %v772_v27, %v762_v54  ;;  %v778_v30 = vadd.f32 %v774_v45, %v763_v56 }
 0x198   : > { %v786_v33 = vadd.f32 %v784_v31, %v777_v29  ;;  %v787_v32 = vadd.f32 %v785_v14, %v778_v30 }
 0x199   : > { %v550_v51 = vpop.permute.xlu1 %549  ;;  %v552_v59 = vpop.permute.xlu0 %551 }
 0x19a   : > { %v555_v9 = vadd.f32 %v550_v51, %v540_v12  ;;  %v556_v36 = vadd.f32 %v552_v59, %v541_v13 }
 0x19d   : > { %v673_v53 = vpop.permute.xlu1 %672  ;;  %v675_v61 = vpop.permute.xlu0 %674 }
 0x19e   : > { %v678_v44 = vadd.f32 %v673_v53, %v663_v25  ;;  %v679_v43 = vadd.f32 %v675_v61, %v664_v38 }
 0x1a1   : > { %v796_v40 = vpop.permute.xlu1 %795  ;;  %v798_v34 = vpop.permute.xlu0 %797 }
 0x1a2   : > { %v801_v52 = vadd.f32 %v796_v40, %v786_v33  ;;  %v802_v15 = vadd.f32 %v798_v34, %v787_v32 }
 0x1a5   : > { %v444_v11 = vpop.permute.xlu1 %443  ;;  %v565_v58 = vpop.permute.xlu0 %564 }
 0x1a6   : > { %v448_v42 = vadd.f32 %v444_v11, %v433_v35  ;;  %v570_v62 = vadd.f32 %v565_v58, %v555_v9 }
 0x1a8   : > { %451 = vst.msk [vmem:[%s1709_s10 + $0x8] sm:$0xff] %vm449_vm6, %v448_v42  ;;  %985 = vst.msk [vmem:[%s1709_s10 + $0x10] sm:$0xff] %vm449_vm6, %v570_v62 }
 0x1a9   : > { %v567_v48 = vpop.permute.xlu1 %566  ;;  %v688_v26 = vpop.permute.xlu0 %687 }
 0x1aa   : > { %v571_v41 = vadd.f32 %v567_v48, %v556_v36  ;;  %v693_v50 = vadd.f32 %v688_v26, %v678_v44 }
 0x1ac   : > { %986 = vst.msk [vmem:[%s1709_s10 + $0x18] sm:$0xff] %vm449_vm6, %v571_v41  ;;  %997 = vst.msk [vmem:[%s1709_s10 + $0x20] sm:$0xff] %vm449_vm6, %v693_v50 }
 0x1ad   : > { %v690_v37 = vpop.permute.xlu1 %689  ;;  %v811_v39 = vpop.permute.xlu0 %810 }
 0x1ae   : > { %v694_v55 = vadd.f32 %v690_v37, %v679_v43  ;;  %v816_v46 = vadd.f32 %v811_v39, %v801_v52 }
 0x1b0   : > { %998 = vst.msk [vmem:[%s1709_s10 + $0x28] sm:$0xff] %vm449_vm6, %v694_v55  ;;  %1009 = vst.msk [vmem:[%s1709_s10 + $0x30] sm:$0xff] %vm449_vm6, %v816_v46 }
 0x1b1   : > { %v813_v57 = vpop.permute.xlu1 %812 }
 0x1b2   : > { %v817_v60 = vadd.f32 %v813_v57, %v802_v15 }
 0x1b4   : > { %1010 = vst.msk [vmem:[%s1709_s10 + $0x38] sm:$0xff] %vm449_vm6, %v817_v60 }
 0x1b5   : > { %1182 = shalt.err (!%p1179_p8)
}
 0x1b6   : > { %s1183_s10 = scalar_lea.hbm %s1759_s20, 1024  ;;  %s1187_s22 = scalar_lea.hbm %s1815_s3, 2048 }
 0x1b7   : > { %p1184_p13 = scmp.ne.s32.totalorder %s1759_s20, %s1183_s10  ;;  %p1188_p12 = scmp.lt.u32.totalorder %s1759_s20, %s1815_s3 }
 0x1b8   : > { %p1189_p2 = scmp.lt.u32.totalorder %s1187_s22, %s1183_s10  ;;  %p1191_p5 = scmp.lt.u32.totalorder %s1183_s10, %s1759_s20 }
 0x1b9   : > { %p1185_p4 = pnand %p1184_p13, %p1834_p0 }
 0x1ba   : > { %p1190_p9 = por %p1189_p2, %p1188_p12 }
 0x1bb   : > { %p1186_p10 = pneg %p1185_p4 }
 0x1bc   : > { %p1192_p1 = por %p1191_p5, %p1190_p9 }
 0x1be   : > { %p1193_p6 = pnand %p1192_p1, %p1186_p10 }
 0x1c0   : > { %1196 = shalt.err (!%p1193_p6)
}
 0x1c1   : > { %s1271_s6 = smov 128   ;;  %s1272_s30 = smov 8  }
 0x1c2   : > { %1028 = dma.vmem_to_hbm [thread:$0]  (%p1834_p0), %s1761_s7, 1024, %s1759_s20, %s822_s15, %s1271_s6, %s1271_s6, %s1272_s30  }
 0x1c3 PF: > { %s853_s19 = sand.u32 1, %s1239_s12   ;;  %p1835_p11 = scmp.ne.s32.totalorder %s1826_s25, 0 }
 0x1c4   : > { %p1836_p7 = scmp.ge.s32.totalorder %s1259_s17, 2  ;;  %s854_s9 = scalar_lea.sflag [#allocation5], %s853_s19 }
 0x1c6   : > { %p1042_p3 = pnand %p1836_p7, %p1835_p11 }
 0x1c8   : > { %1234 = dma.done.wait (!%p1042_p3), %s854_s9, 1024  }
 0x1c9   : > { %1236 = vsyncadd (!%p1042_p3), %s854_s9, 4294966272  ;;  %s21_s17 = sadd.s32 1, %s1259_s17   ;;  %s1837_s12 = smov %s1243_s13 }
 0x1ca   : > { %p18_p8 = scmp.ge.s32.totalorder %s21_s17, 4   ;;  %s1838_s13 = smov %s1247_s14 }
 0x1cb   : > { %s1839_s14 = smov %s1404_s8  ;;  %s1840_s15 = smov %s1255_s16 }
 0x1cc   : > { %s1841_s16 = smov %s1843_s18  ;;  %20 = sbr.rel (!%p18_p8) target bundleno = 8 (0x8), region = 95 }
 0x1d3   :  { %859 = vsyncpa [#allocation4], 1 }
 0x1d4   :  { %861 = vsyncpa [#allocation4 + $0x1], 1 }
 0x1d5   :  { %862 = vsyncpa [#allocation5], 1 }
 0x1d6   :  { %864 = vsyncpa [#allocation5 + $0x1], 1 }
 0x1d7   :  { %865 = vsyncpa [#allocation6], 1 }
 0x1d8   :  { %867 = vsyncpa [#allocation6 + $0x1], 1 }
 0x1d9   :  { %868 = vsyncpa [#allocation9], 1 }

</bundles_post_ra>
